<compile_context>
chip_gen: v5e
topology: v5e:2x2
jax: 0.10.0
libtpu: 0.0.40
codegen_flags: <defaults>
</compile_context>

<pallas_src>
import functools

import jax
import jax.numpy as jnp
from jax import lax
from jax.experimental import pallas as pl
from jax.experimental.pallas import tpu as pltpu


def _ln(x, g, b, eps):
  """LayerNorm over the last axis (f32). g, b broadcast as (1, D)."""
  mu = jnp.mean(x, axis=-1, keepdims=True)
  var = jnp.mean((x - mu) ** 2, axis=-1, keepdims=True)
  return (x - mu) * lax.rsqrt(var + eps) * g + b


def _vmem_limit_bytes():
  try:
    cap = pltpu.get_tpu_info().vmem_capacity_bytes
    return min(int(cap * 0.8), 100 * 1024 * 1024)
  except Exception:
    return 56 * 1024 * 1024  # safe on all generations (v7x physical = 64 MiB)


# --------------------------------------------------------------------------
# Fused encoder + final-LN kernel: one (batch tile, layer) grid step.
# --------------------------------------------------------------------------
def fused_encoder_kernel(
    x_ref, small_ref, wqkv_ref, wo_ref, w1_ref, w2_ref, fg_ref, fb_ref,
    out_ref, state, qkv_buf, ctx_buf,
    *, num_heads, eps, seq_len, batch_tile):
  l = pl.program_id(1)
  D = state.shape[-1]
  I = w1_ref.shape[-1]
  S = seq_len
  BT = batch_tile
  dh = D // num_heads

  @pl.when(l == 0)
  def _():
    state[...] = x_ref[...].astype(jnp.float32)

  x = state[...]                                        # (BT*S, D) f32

  # small packed params: rows = ln1g, ln1b, bqkv, bo, ln2g, ln2b, b1, b2
  ln1g = small_ref[0:1, :D]
  ln1b = small_ref[1:2, :D]
  bqkv = small_ref[2:3, :3 * D]
  bo = small_ref[3:4, :D]
  ln2g = small_ref[4:5, :D]
  ln2b = small_ref[5:6, :D]
  b1 = small_ref[6:7, :I]
  b2 = small_ref[7:8, :D]

  # ---- self-attention block ----
  h = _ln(x, ln1g, ln1b, eps)
  # fused (D, 3D) projection; 1/sqrt(dh) is already folded into the q slice.
  qkv_buf[...] = (jnp.dot(h.astype(jnp.bfloat16), wqkv_ref[...],
                          preferred_element_type=jnp.float32)
                  + bqkv).astype(jnp.bfloat16)          # (BT*S, 3D)

  # causal mask (same semantics as _create_4d_causal_attention_mask)
  row_i = lax.broadcasted_iota(jnp.int32, (S, S), 0)
  col_i = lax.broadcasted_iota(jnp.int32, (S, S), 1)
  keep = col_i <= row_i

  def seq_body(b, carry):
    r0 = pl.multiple_of(b * S, 16)                      # S is a multiple of 16
    for hh in range(num_heads):                         # static lane offsets
      c0 = hh * dh
      qh = qkv_buf[pl.ds(r0, S), pl.ds(c0, dh)]
      kh = qkv_buf[pl.ds(r0, S), pl.ds(D + c0, dh)]
      vh = qkv_buf[pl.ds(r0, S), pl.ds(2 * D + c0, dh)]
      s = lax.dot_general(qh, kh, (((1,), (1,)), ((), ())),
                          preferred_element_type=jnp.float32)   # (S, S)
      s = jnp.where(keep, s, -1e9)
      s = s - jnp.max(s, axis=-1, keepdims=True)
      p = jnp.exp(s)
      p = p * pl.reciprocal(jnp.sum(p, axis=-1, keepdims=True), approx=True)
      o = jnp.dot(p.astype(jnp.bfloat16), vh,
                  preferred_element_type=jnp.float32)           # (S, dh)
      ctx_buf[pl.ds(r0, S), pl.ds(c0, dh)] = o.astype(jnp.bfloat16)
    return carry

  lax.fori_loop(0, BT, seq_body, 0)

  # single full-width out projection from the context slab
  attn = jnp.dot(ctx_buf[...], wo_ref[...],
                 preferred_element_type=jnp.float32) + bo
  x = x + attn

  # ---- MLP block (quick_gelu) ----
  h2 = _ln(x, ln2g, ln2b, eps)
  f = jnp.dot(h2.astype(jnp.bfloat16), w1_ref[...],
              preferred_element_type=jnp.float32) + b1
  f = f * jax.nn.sigmoid(1.702 * f)
  f = jnp.dot(f.astype(jnp.bfloat16), w2_ref[...],
              preferred_element_type=jnp.float32) + b2
  x = x + f

  state[...] = x

  # fused final LayerNorm epilogue
  @pl.when(l == pl.num_programs(1) - 1)
  def _():
    out_ref[...] = _ln(x, fg_ref[...], fb_ref[...], eps).astype(out_ref.dtype)


# --------------------------------------------------------------------------
# pallas_call wrapper
# --------------------------------------------------------------------------
def run_encoder(x_flat, stacked, final_g, final_b, *, num_heads, eps,
                seq_len, batch_tile):
  N, D = x_flat.shape
  S = seq_len
  BT = batch_tile
  n_bt = N // (BT * S)
  L = stacked["wqkv"].shape[0]

  def lspec(arr):
    nd = arr.ndim
    return pl.BlockSpec((None,) + tuple(arr.shape[1:]),
                        lambda b, l, nd=nd: (l,) + (0,) * (nd - 1))

  kern = functools.partial(
      fused_encoder_kernel, num_heads=num_heads, eps=eps,
      seq_len=S, batch_tile=BT)

  return pl.pallas_call(
      kern,
      out_shape=jax.ShapeDtypeStruct((N, D), jnp.float32),
      grid_spec=pltpu.PrefetchScalarGridSpec(
          num_scalar_prefetch=0,
          grid=(n_bt, L),
          in_specs=[
              pl.BlockSpec((BT * S, D), lambda b, l: (b, 0)),
              lspec(stacked["small"]),
              lspec(stacked["wqkv"]),
              lspec(stacked["wo"]),
              lspec(stacked["w1"]),
              lspec(stacked["w2"]),
              pl.BlockSpec((1, D), lambda b, l: (0, 0)),
              pl.BlockSpec((1, D), lambda b, l: (0, 0)),
          ],
          out_specs=pl.BlockSpec((BT * S, D), lambda b, l: (b, 0)),
          scratch_shapes=[
              pltpu.VMEM((BT * S, D), jnp.float32),        # carried hidden state
              pltpu.VMEM((BT * S, 3 * D), jnp.bfloat16),   # qkv slab
              pltpu.VMEM((BT * S, D), jnp.bfloat16),       # attention context slab
          ],
      ),
      compiler_params=pltpu.CompilerParams(
          dimension_semantics=("parallel", "arbitrary"),
          vmem_limit_bytes=_vmem_limit_bytes()),
  )(x_flat, stacked["small"], stacked["wqkv"], stacked["wo"],
    stacked["w1"], stacked["w2"], final_g, final_b)


# --------------------------------------------------------------------------
# Parameters (large weights bf16; LN params / biases packed in one f32 tensor)
# --------------------------------------------------------------------------
def init_params(key, *, vocab, max_pos, D, I, L, num_heads):
  dh = D // num_heads
  attn_scale = dh ** -0.5
  W = max(3 * D, I)
  ks = jax.random.split(key, 2 + L)
  wscale = 0.02

  def rand(k, shape):
    return jax.random.normal(k, shape, jnp.float32) * wscale

  def pad_row(v):
    return jnp.pad(v[None, :], ((0, 0), (0, W - v.shape[0])))

  small_l, wqkv_l, wo_l, w1_l, w2_l = [], [], [], [], []
  for li in range(L):
    kk = jax.random.split(ks[2 + li], 6)
    wq = rand(kk[0], (D, D)) * attn_scale          # fold 1/sqrt(dh) into Wq
    wk = rand(kk[1], (D, D))
    wv = rand(kk[2], (D, D))
    bq = jnp.zeros((D,), jnp.float32) * attn_scale  # (and into bq)
    bk = jnp.zeros((D,), jnp.float32)
    bv = jnp.zeros((D,), jnp.float32)
    small_l.append(jnp.concatenate([
        pad_row(jnp.ones((D,), jnp.float32)),       # ln1g
        pad_row(jnp.zeros((D,), jnp.float32)),      # ln1b
        pad_row(jnp.concatenate([bq, bk, bv])),     # bqkv
        pad_row(jnp.zeros((D,), jnp.float32)),      # bo
        pad_row(jnp.ones((D,), jnp.float32)),       # ln2g
        pad_row(jnp.zeros((D,), jnp.float32)),      # ln2b
        pad_row(jnp.zeros((I,), jnp.float32)),      # b1
        pad_row(jnp.zeros((D,), jnp.float32)),      # b2
    ], axis=0))                                     # (8, W)
    wqkv_l.append(jnp.concatenate([wq, wk, wv], axis=1).astype(jnp.bfloat16))
    wo_l.append(rand(kk[3], (D, D)).astype(jnp.bfloat16))
    w1_l.append(rand(kk[4], (D, I)).astype(jnp.bfloat16))
    w2_l.append(rand(kk[5], (I, D)).astype(jnp.bfloat16))

  stacked = dict(
      small=jnp.stack(small_l),    # (L, 8, W) f32
      wqkv=jnp.stack(wqkv_l),      # (L, D, 3D) bf16
      wo=jnp.stack(wo_l),          # (L, D, D)  bf16
      w1=jnp.stack(w1_l),          # (L, D, I)  bf16
      w2=jnp.stack(w2_l),          # (L, I, D)  bf16
  )
  # TODO(synk): on v7x the four big weights could be stored fp8 (with
  # per-column scales) to halve weight HBM/VMEM if accuracy budget allows.
  return {
      "tok_emb": rand(ks[0], (vocab, D)),
      "pos_emb": rand(ks[1], (max_pos, D)),
      "final_ln_g": jnp.ones((1, D), jnp.float32),
      "final_ln_b": jnp.zeros((1, D), jnp.float32),
      "stacked": stacked,
  }


# --------------------------------------------------------------------------
# Forward pass (matches CustomCLIPTextTransformer.forward with input_ids)
# --------------------------------------------------------------------------
def clip_text_transformer(input_ids, params, *, num_heads, eps,
                          eos_token_id=2, batch_tile=8):
  B, S = input_ids.shape
  D = params["tok_emb"].shape[1]

  positions = jnp.arange(S)
  x = params["tok_emb"][input_ids] + params["pos_emb"][positions][None, :, :]

  # pad S to a multiple of 16 (bf16 sublane tiles) and B to a multiple of BT;
  # padded tokens/rows never influence real rows (causal mask) and are
  # sliced off before pooling.
  S_pad = ((S + 15) // 16) * 16
  BT = max(1, min(batch_tile, B))
  B_pad = ((B + BT - 1) // BT) * BT
  if S_pad != S or B_pad != B:
    x = jnp.pad(x, ((0, B_pad - B), (0, S_pad - S), (0, 0)))

  x_flat = x.reshape(B_pad * S_pad, D)
  out_flat = run_encoder(
      x_flat, params["stacked"], params["final_ln_g"], params["final_ln_b"],
      num_heads=num_heads, eps=eps, seq_len=S_pad, batch_tile=BT)
  last_hidden_state = out_flat.reshape(B_pad, S_pad, D)[:B, :S]

  # Pooling (eos_token_id == 2 legacy path: argmax of the raw ids).
  if eos_token_id == 2:
    eos_pos = jnp.argmax(input_ids.astype(jnp.int32), axis=-1)
  else:
    eos_pos = jnp.argmax((input_ids.astype(jnp.int32) == eos_token_id
                          ).astype(jnp.int32), axis=-1)
  pooled_output = last_hidden_state[jnp.arange(B), eos_pos]
  return last_hidden_state, pooled_output


if __name__ == "__main__":
  # Small synthetic CLIP text config.
  B, S = 2, 8
  D, H, I, L = 32, 4, 64, 2
  VOCAB, MAX_POS = 64, 8
  EPS = 1e-5

  key = jax.random.PRNGKey(0)
  k_param, k_ids = jax.random.split(key)
  params = init_params(k_param, vocab=VOCAB, max_pos=MAX_POS, D=D, I=I, L=L,
                       num_heads=H)

  input_ids = jax.random.randint(k_ids, (B, S), 0, VOCAB - 1, dtype=jnp.int32)
  # put an "EOS" (highest id) token at the end so argmax pooling is meaningful
  input_ids = input_ids.at[:, -1].set(VOCAB - 1)

  fwd = jax.jit(functools.partial(clip_text_transformer, num_heads=H,
                                  eps=EPS, eos_token_id=2, batch_tile=8))
  last_hidden_state, pooled_output = fwd(input_ids, params)
  jax.block_until_ready((last_hidden_state, pooled_output))

  assert last_hidden_state.shape == (B, S, D)
  assert pooled_output.shape == (B, D)
  assert bool(jnp.all(jnp.isfinite(last_hidden_state)))
  assert bool(jnp.all(jnp.isfinite(pooled_output)))
  print("KERNEL_OK")
</pallas_src>

<mosaic_0001>
module attributes {stable_mosaic.version = 11 : i64} {
  func.func @fused_encoder_kernel(%arg0: i32, %arg1: i32, %arg2: memref<32x32xf32, #tpu.memory_space<vmem>>, %arg3: memref<1x8x96xf32, #tpu.memory_space<vmem>>, %arg4: memref<1x32x96xbf16, #tpu.memory_space<vmem>>, %arg5: memref<1x32x32xbf16, #tpu.memory_space<vmem>>, %arg6: memref<1x32x64xbf16, #tpu.memory_space<vmem>>, %arg7: memref<1x64x32xbf16, #tpu.memory_space<vmem>>, %arg8: memref<1x32xf32, #tpu.memory_space<vmem>>, %arg9: memref<1x32xf32, #tpu.memory_space<vmem>>, %arg10: memref<32x32xf32, #tpu.memory_space<vmem>>, %arg11: memref<32x32xf32, #tpu.memory_space<vmem>>, %arg12: memref<32x96xbf16, #tpu.memory_space<vmem>>, %arg13: memref<32x32xbf16, #tpu.memory_space<vmem>>) attributes {dimension_semantics = [#tpu.dimension_semantics<parallel>, #tpu.dimension_semantics<arbitrary>], iteration_bounds = array<i64: 1, 2>, scalar_prefetch = 0 : i64, scratch_operands = 3 : i64, tpu.core_type = #tpu.core_type<tc>, window_params = [{transform_indices = @transform_0, window_bounds = array<i64: 32, 32>}, {transform_indices = @transform_1, window_bounds = array<i64: 1, 8, 96>}, {transform_indices = @transform_2, window_bounds = array<i64: 1, 32, 96>}, {transform_indices = @transform_3, window_bounds = array<i64: 1, 32, 32>}, {transform_indices = @transform_4, window_bounds = array<i64: 1, 32, 64>}, {transform_indices = @transform_5, window_bounds = array<i64: 1, 64, 32>}, {pipeline_mode = #tpu.pipeline_mode<synchronous>, transform_indices = @transform_6, window_bounds = array<i64: 1, 32>}, {pipeline_mode = #tpu.pipeline_mode<synchronous>, transform_indices = @transform_7, window_bounds = array<i64: 1, 32>}, {transform_indices = @transform_8, window_bounds = array<i64: 32, 32>}]} {
    %c0_i32 = arith.constant 0 : i32
    %0 = arith.cmpi eq, %arg1, %c0_i32 : i32
    %1 = arith.extui %0 : i1 to i32
    %c0_i32_0 = arith.constant 0 : i32
    %2 = arith.cmpi ne, %1, %c0_i32_0 : i32
    scf.if %2 {
      %c0_56 = arith.constant 0 : index
      %c0_57 = arith.constant 0 : index
      %108 = vector.load %arg2[%c0_56, %c0_57] : memref<32x32xf32, #tpu.memory_space<vmem>>, vector<32x32xf32>
      %c0_58 = arith.constant 0 : index
      %c0_59 = arith.constant 0 : index
      %109 = vector.load %arg11[%c0_58, %c0_59] : memref<32x32xf32, #tpu.memory_space<vmem>>, vector<32x32xf32>
      tpu.vector_store %arg11[%c0_58, %c0_59], %108 {strides = array<i32>} : memref<32x32xf32, #tpu.memory_space<vmem>>, vector<32x32xf32>,
    } else {
    }
    %c0 = arith.constant 0 : index
    %c0_1 = arith.constant 0 : index
    %3 = vector.load %arg11[%c0, %c0_1] : memref<32x32xf32, #tpu.memory_space<vmem>>, vector<32x32xf32>
    %c0_2 = arith.constant 0 : index
    %c0_3 = arith.constant 0 : index
    %c0_4 = arith.constant 0 : index
    %4 = vector.load %arg3[%c0_2, %c0_3, %c0_4] : memref<1x8x96xf32, #tpu.memory_space<vmem>>, vector<1x1x32xf32>
    %5 = vector.shape_cast %4 : vector<1x1x32xf32> to vector<1x32xf32>
    %c0_5 = arith.constant 0 : index
    %c1 = arith.constant 1 : index
    %c0_6 = arith.constant 0 : index
    %6 = vector.load %arg3[%c0_5, %c1, %c0_6] : memref<1x8x96xf32, #tpu.memory_space<vmem>>, vector<1x1x32xf32>
    %7 = vector.shape_cast %6 : vector<1x1x32xf32> to vector<1x32xf32>
    %c0_7 = arith.constant 0 : index
    %c2 = arith.constant 2 : index
    %c0_8 = arith.constant 0 : index
    %8 = vector.load %arg3[%c0_7, %c2, %c0_8] : memref<1x8x96xf32, #tpu.memory_space<vmem>>, vector<1x1x96xf32>
    %9 = vector.shape_cast %8 : vector<1x1x96xf32> to vector<1x96xf32>
    %c0_9 = arith.constant 0 : index
    %c3 = arith.constant 3 : index
    %c0_10 = arith.constant 0 : index
    %10 = vector.load %arg3[%c0_9, %c3, %c0_10] : memref<1x8x96xf32, #tpu.memory_space<vmem>>, vector<1x1x32xf32>
    %11 = vector.shape_cast %10 : vector<1x1x32xf32> to vector<1x32xf32>
    %c0_11 = arith.constant 0 : index
    %c4 = arith.constant 4 : index
    %c0_12 = arith.constant 0 : index
    %12 = vector.load %arg3[%c0_11, %c4, %c0_12] : memref<1x8x96xf32, #tpu.memory_space<vmem>>, vector<1x1x32xf32>
    %13 = vector.shape_cast %12 : vector<1x1x32xf32> to vector<1x32xf32>
    %c0_13 = arith.constant 0 : index
    %c5 = arith.constant 5 : index
    %c0_14 = arith.constant 0 : index
    %14 = vector.load %arg3[%c0_13, %c5, %c0_14] : memref<1x8x96xf32, #tpu.memory_space<vmem>>, vector<1x1x32xf32>
    %15 = vector.shape_cast %14 : vector<1x1x32xf32> to vector<1x32xf32>
    %c0_15 = arith.constant 0 : index
    %c6 = arith.constant 6 : index
    %c0_16 = arith.constant 0 : index
    %16 = vector.load %arg3[%c0_15, %c6, %c0_16] : memref<1x8x96xf32, #tpu.memory_space<vmem>>, vector<1x1x64xf32>
    %17 = vector.shape_cast %16 : vector<1x1x64xf32> to vector<1x64xf32>
    %c0_17 = arith.constant 0 : index
    %c7 = arith.constant 7 : index
    %c0_18 = arith.constant 0 : index
    %18 = vector.load %arg3[%c0_17, %c7, %c0_18] : memref<1x8x96xf32, #tpu.memory_space<vmem>>, vector<1x1x32xf32>
    %19 = vector.shape_cast %18 : vector<1x1x32xf32> to vector<1x32xf32>
    %cst = arith.constant dense<0.000000e+00> : vector<32xf32>
    %20 = vector.multi_reduction <add>, %3, %cst [1] : vector<32x32xf32> to vector<32xf32>
    %21 = vector.shape_cast %20 : vector<32xf32> to vector<32x1xf32>
    %cst_19 = arith.constant 3.200000e+01 : f32
    %22 = vector.broadcast %cst_19 : f32 to vector<32x1xf32>
    %23 = arith.divf %21, %22 : vector<32x1xf32>
    %24 = vector.broadcast %23 : vector<32x1xf32> to vector<32x32xf32>
    %25 = arith.subf %3, %24 : vector<32x32xf32>
    %26 = arith.mulf %25, %25 : vector<32x32xf32>
    %cst_20 = arith.constant dense<0.000000e+00> : vector<32xf32>
    %27 = vector.multi_reduction <add>, %26, %cst_20 [1] : vector<32x32xf32> to vector<32xf32>
    %28 = vector.shape_cast %27 : vector<32xf32> to vector<32x1xf32>
    %cst_21 = arith.constant 3.200000e+01 : f32
    %29 = vector.broadcast %cst_21 : f32 to vector<32x1xf32>
    %30 = arith.divf %28, %29 : vector<32x1xf32>
    %31 = vector.broadcast %23 : vector<32x1xf32> to vector<32x32xf32>
    %32 = arith.subf %3, %31 : vector<32x32xf32>
    %cst_22 = arith.constant 9.99999974E-6 : f32
    %33 = vector.broadcast %cst_22 : f32 to vector<32x1xf32>
    %34 = arith.addf %30, %33 : vector<32x1xf32>
    %35 = math.rsqrt %34 : vector<32x1xf32>
    %36 = vector.broadcast %35 : vector<32x1xf32> to vector<32x32xf32>
    %37 = arith.mulf %32, %36 : vector<32x32xf32>
    %38 = vector.broadcast %5 : vector<1x32xf32> to vector<32x32xf32>
    %39 = arith.mulf %37, %38 : vector<32x32xf32>
    %40 = vector.broadcast %7 : vector<1x32xf32> to vector<32x32xf32>
    %41 = arith.addf %39, %40 : vector<32x32xf32>
    %42 = arith.truncf %41 : vector<32x32xf32> to vector<32x32xbf16>
    %c0_23 = arith.constant 0 : index
    %c0_24 = arith.constant 0 : index
    %c0_25 = arith.constant 0 : index
    %43 = vector.load %arg4[%c0_23, %c0_24, %c0_25] : memref<1x32x96xbf16, #tpu.memory_space<vmem>>, vector<1x32x96xbf16>
    %44 = vector.shape_cast %43 : vector<1x32x96xbf16> to vector<32x96xbf16>
    %cst_26 = arith.constant dense<0.000000e+00> : vector<32x96xf32>
    %45 = tpu.matmul %42, %44, %cst_26 {dimension_numbers = #tpu.dot_dimension_numbers<[1], [0], [0], [1], [0, 0, 1, 1], [], []>} : vector<32x32xbf16>, vector<32x96xbf16>, vector<32x96xf32> -> vector<32x96xf32>
    %46 = vector.broadcast %9 : vector<1x96xf32> to vector<32x96xf32>
    %47 = arith.addf %45, %46 : vector<32x96xf32>
    %48 = arith.truncf %47 : vector<32x96xf32> to vector<32x96xbf16>
    %c0_27 = arith.constant 0 : index
    %c0_28 = arith.constant 0 : index
    %49 = vector.load %arg12[%c0_27, %c0_28] : memref<32x96xbf16, #tpu.memory_space<vmem>>, vector<32x96xbf16>
    tpu.vector_store %arg12[%c0_27, %c0_28], %48 {strides = array<i32>} : memref<32x96xbf16, #tpu.memory_space<vmem>>, vector<32x96xbf16>,
    %50 = tpu.iota {dimensions = array<i32: 0>} : vector<16x16xi32>
    %51 = tpu.iota {dimensions = array<i32: 1>} : vector<16x16xi32>
    %52 = arith.cmpi sle, %51, %50 : vector<16x16xi32>
    %c0_i32_29 = arith.constant 0 : i32
    %c2_i32 = arith.constant 2 : i32
    %53 = arith.addi %c0_i32_29, %c2_i32 : i32
    %c1_i32 = arith.constant 1 : i32
    scf.for %arg14 = %c0_i32_29 to %53 step %c1_i32  : i32 {
      %c16_i32 = arith.constant 16 : i32
      %108 = arith.muli %arg14, %c16_i32 : i32
      %109 = tpu.assume_multiple %108, 16 : i32
      %110 = arith.index_cast %109 : i32 to index
      %c0_56 = arith.constant 0 : index
      %111 = vector.load %arg12[%110, %c0_56] : memref<32x96xbf16, #tpu.memory_space<vmem>>, vector<16x8xbf16>
      %112 = arith.index_cast %109 : i32 to index
      %c32 = arith.constant 32 : index
      %113 = vector.load %arg12[%112, %c32] : memref<32x96xbf16, #tpu.memory_space<vmem>>, vector<16x8xbf16>
      %114 = arith.index_cast %109 : i32 to index
      %c64 = arith.constant 64 : index
      %115 = vector.load %arg12[%114, %c64] : memref<32x96xbf16, #tpu.memory_space<vmem>>, vector<16x8xbf16>
      %cst_57 = arith.constant dense<0.000000e+00> : vector<16x16xf32>
      %116 = tpu.matmul %111, %113, %cst_57 {dimension_numbers = #tpu.dot_dimension_numbers<[1], [1], [0], [0], [0, 0, 1, 0], [], []>} : vector<16x8xbf16>, vector<16x8xbf16>, vector<16x16xf32> -> vector<16x16xf32>
      %cst_58 = arith.constant -1.000000e+09 : f32
      %117 = vector.broadcast %cst_58 : f32 to vector<16x16xf32>
      %118 = arith.select %52, %116, %117 : vector<16x16xi1>, vector<16x16xf32>
      %cst_59 = arith.constant dense<0xFF800000> : vector<16xf32>
      %119 = vector.multi_reduction <maximumf>, %118, %cst_59 [1] : vector<16x16xf32> to vector<16xf32>
      %120 = vector.shape_cast %119 : vector<16xf32> to vector<16x1xf32>
      %121 = vector.broadcast %120 : vector<16x1xf32> to vector<16x16xf32>
      %122 = arith.subf %118, %121 : vector<16x16xf32>
      %123 = math.exp %122 : vector<16x16xf32>
      %cst_60 = arith.constant dense<0.000000e+00> : vector<16xf32>
      %124 = vector.multi_reduction <add>, %123, %cst_60 [1] : vector<16x16xf32> to vector<16xf32>
      %125 = vector.shape_cast %124 : vector<16xf32> to vector<16x1xf32>
      %126 = tpu.reciprocal %125 {approx = true} : vector<16x1xf32> -> vector<16x1xf32>
      %127 = vector.broadcast %126 : vector<16x1xf32> to vector<16x16xf32>
      %128 = arith.mulf %123, %127 : vector<16x16xf32>
      %129 = arith.truncf %128 : vector<16x16xf32> to vector<16x16xbf16>
      %cst_61 = arith.constant dense<0.000000e+00> : vector<16x8xf32>
      %130 = tpu.matmul %129, %115, %cst_61 {dimension_numbers = #tpu.dot_dimension_numbers<[1], [0], [0], [1], [0, 0, 1, 1], [], []>} : vector<16x16xbf16>, vector<16x8xbf16>, vector<16x8xf32> -> vector<16x8xf32>
      %131 = arith.truncf %130 : vector<16x8xf32> to vector<16x8xbf16>
      %132 = arith.index_cast %109 : i32 to index
      %c0_62 = arith.constant 0 : index
      %133 = vector.load %arg13[%132, %c0_62] : memref<32x32xbf16, #tpu.memory_space<vmem>>, vector<16x8xbf16>
      tpu.vector_store %arg13[%132, %c0_62], %131 {strides = array<i32>} : memref<32x32xbf16, #tpu.memory_space<vmem>>, vector<16x8xbf16>,
      %134 = arith.index_cast %109 : i32 to index
      %c8 = arith.constant 8 : index
      %135 = vector.load %arg12[%134, %c8] : memref<32x96xbf16, #tpu.memory_space<vmem>>, vector<16x8xbf16>
      %136 = arith.index_cast %109 : i32 to index
      %c40 = arith.constant 40 : index
      %137 = vector.load %arg12[%136, %c40] : memref<32x96xbf16, #tpu.memory_space<vmem>>, vector<16x8xbf16>
      %138 = arith.index_cast %109 : i32 to index
      %c72 = arith.constant 72 : index
      %139 = vector.load %arg12[%138, %c72] : memref<32x96xbf16, #tpu.memory_space<vmem>>, vector<16x8xbf16>
      %cst_63 = arith.constant dense<0.000000e+00> : vector<16x16xf32>
      %140 = tpu.matmul %135, %137, %cst_63 {dimension_numbers = #tpu.dot_dimension_numbers<[1], [1], [0], [0], [0, 0, 1, 0], [], []>} : vector<16x8xbf16>, vector<16x8xbf16>, vector<16x16xf32> -> vector<16x16xf32>
      %cst_64 = arith.constant -1.000000e+09 : f32
      %141 = vector.broadcast %cst_64 : f32 to vector<16x16xf32>
      %142 = arith.select %52, %140, %141 : vector<16x16xi1>, vector<16x16xf32>
      %cst_65 = arith.constant dense<0xFF800000> : vector<16xf32>
      %143 = vector.multi_reduction <maximumf>, %142, %cst_65 [1] : vector<16x16xf32> to vector<16xf32>
      %144 = vector.shape_cast %143 : vector<16xf32> to vector<16x1xf32>
      %145 = vector.broadcast %144 : vector<16x1xf32> to vector<16x16xf32>
      %146 = arith.subf %142, %145 : vector<16x16xf32>
      %147 = math.exp %146 : vector<16x16xf32>
      %cst_66 = arith.constant dense<0.000000e+00> : vector<16xf32>
      %148 = vector.multi_reduction <add>, %147, %cst_66 [1] : vector<16x16xf32> to vector<16xf32>
      %149 = vector.shape_cast %148 : vector<16xf32> to vector<16x1xf32>
      %150 = tpu.reciprocal %149 {approx = true} : vector<16x1xf32> -> vector<16x1xf32>
      %151 = vector.broadcast %150 : vector<16x1xf32> to vector<16x16xf32>
      %152 = arith.mulf %147, %151 : vector<16x16xf32>
      %153 = arith.truncf %152 : vector<16x16xf32> to vector<16x16xbf16>
      %cst_67 = arith.constant dense<0.000000e+00> : vector<16x8xf32>
      %154 = tpu.matmul %153, %139, %cst_67 {dimension_numbers = #tpu.dot_dimension_numbers<[1], [0], [0], [1], [0, 0, 1, 1], [], []>} : vector<16x16xbf16>, vector<16x8xbf16>, vector<16x8xf32> -> vector<16x8xf32>
      %155 = arith.truncf %154 : vector<16x8xf32> to vector<16x8xbf16>
      %156 = arith.index_cast %109 : i32 to index
      %c8_68 = arith.constant 8 : index
      %157 = vector.load %arg13[%156, %c8_68] : memref<32x32xbf16, #tpu.memory_space<vmem>>, vector<16x8xbf16>
      tpu.vector_store %arg13[%156, %c8_68], %155 {strides = array<i32>} : memref<32x32xbf16, #tpu.memory_space<vmem>>, vector<16x8xbf16>,
      %158 = arith.index_cast %109 : i32 to index
      %c16 = arith.constant 16 : index
      %159 = vector.load %arg12[%158, %c16] : memref<32x96xbf16, #tpu.memory_space<vmem>>, vector<16x8xbf16>
      %160 = arith.index_cast %109 : i32 to index
      %c48 = arith.constant 48 : index
      %161 = vector.load %arg12[%160, %c48] : memref<32x96xbf16, #tpu.memory_space<vmem>>, vector<16x8xbf16>
      %162 = arith.index_cast %109 : i32 to index
      %c80 = arith.constant 80 : index
      %163 = vector.load %arg12[%162, %c80] : memref<32x96xbf16, #tpu.memory_space<vmem>>, vector<16x8xbf16>
      %cst_69 = arith.constant dense<0.000000e+00> : vector<16x16xf32>
      %164 = tpu.matmul %159, %161, %cst_69 {dimension_numbers = #tpu.dot_dimension_numbers<[1], [1], [0], [0], [0, 0, 1, 0], [], []>} : vector<16x8xbf16>, vector<16x8xbf16>, vector<16x16xf32> -> vector<16x16xf32>
      %cst_70 = arith.constant -1.000000e+09 : f32
      %165 = vector.broadcast %cst_70 : f32 to vector<16x16xf32>
      %166 = arith.select %52, %164, %165 : vector<16x16xi1>, vector<16x16xf32>
      %cst_71 = arith.constant dense<0xFF800000> : vector<16xf32>
      %167 = vector.multi_reduction <maximumf>, %166, %cst_71 [1] : vector<16x16xf32> to vector<16xf32>
      %168 = vector.shape_cast %167 : vector<16xf32> to vector<16x1xf32>
      %169 = vector.broadcast %168 : vector<16x1xf32> to vector<16x16xf32>
      %170 = arith.subf %166, %169 : vector<16x16xf32>
      %171 = math.exp %170 : vector<16x16xf32>
      %cst_72 = arith.constant dense<0.000000e+00> : vector<16xf32>
      %172 = vector.multi_reduction <add>, %171, %cst_72 [1] : vector<16x16xf32> to vector<16xf32>
      %173 = vector.shape_cast %172 : vector<16xf32> to vector<16x1xf32>
      %174 = tpu.reciprocal %173 {approx = true} : vector<16x1xf32> -> vector<16x1xf32>
      %175 = vector.broadcast %174 : vector<16x1xf32> to vector<16x16xf32>
      %176 = arith.mulf %171, %175 : vector<16x16xf32>
      %177 = arith.truncf %176 : vector<16x16xf32> to vector<16x16xbf16>
      %cst_73 = arith.constant dense<0.000000e+00> : vector<16x8xf32>
      %178 = tpu.matmul %177, %163, %cst_73 {dimension_numbers = #tpu.dot_dimension_numbers<[1], [0], [0], [1], [0, 0, 1, 1], [], []>} : vector<16x16xbf16>, vector<16x8xbf16>, vector<16x8xf32> -> vector<16x8xf32>
      %179 = arith.truncf %178 : vector<16x8xf32> to vector<16x8xbf16>
      %180 = arith.index_cast %109 : i32 to index
      %c16_74 = arith.constant 16 : index
      %181 = vector.load %arg13[%180, %c16_74] : memref<32x32xbf16, #tpu.memory_space<vmem>>, vector<16x8xbf16>
      tpu.vector_store %arg13[%180, %c16_74], %179 {strides = array<i32>} : memref<32x32xbf16, #tpu.memory_space<vmem>>, vector<16x8xbf16>,
      %182 = arith.index_cast %109 : i32 to index
      %c24 = arith.constant 24 : index
      %183 = vector.load %arg12[%182, %c24] : memref<32x96xbf16, #tpu.memory_space<vmem>>, vector<16x8xbf16>
      %184 = arith.index_cast %109 : i32 to index
      %c56 = arith.constant 56 : index
      %185 = vector.load %arg12[%184, %c56] : memref<32x96xbf16, #tpu.memory_space<vmem>>, vector<16x8xbf16>
      %186 = arith.index_cast %109 : i32 to index
      %c88 = arith.constant 88 : index
      %187 = vector.load %arg12[%186, %c88] : memref<32x96xbf16, #tpu.memory_space<vmem>>, vector<16x8xbf16>
      %cst_75 = arith.constant dense<0.000000e+00> : vector<16x16xf32>
      %188 = tpu.matmul %183, %185, %cst_75 {dimension_numbers = #tpu.dot_dimension_numbers<[1], [1], [0], [0], [0, 0, 1, 0], [], []>} : vector<16x8xbf16>, vector<16x8xbf16>, vector<16x16xf32> -> vector<16x16xf32>
      %cst_76 = arith.constant -1.000000e+09 : f32
      %189 = vector.broadcast %cst_76 : f32 to vector<16x16xf32>
      %190 = arith.select %52, %188, %189 : vector<16x16xi1>, vector<16x16xf32>
      %cst_77 = arith.constant dense<0xFF800000> : vector<16xf32>
      %191 = vector.multi_reduction <maximumf>, %190, %cst_77 [1] : vector<16x16xf32> to vector<16xf32>
      %192 = vector.shape_cast %191 : vector<16xf32> to vector<16x1xf32>
      %193 = vector.broadcast %192 : vector<16x1xf32> to vector<16x16xf32>
      %194 = arith.subf %190, %193 : vector<16x16xf32>
      %195 = math.exp %194 : vector<16x16xf32>
      %cst_78 = arith.constant dense<0.000000e+00> : vector<16xf32>
      %196 = vector.multi_reduction <add>, %195, %cst_78 [1] : vector<16x16xf32> to vector<16xf32>
      %197 = vector.shape_cast %196 : vector<16xf32> to vector<16x1xf32>
      %198 = tpu.reciprocal %197 {approx = true} : vector<16x1xf32> -> vector<16x1xf32>
      %199 = vector.broadcast %198 : vector<16x1xf32> to vector<16x16xf32>
      %200 = arith.mulf %195, %199 : vector<16x16xf32>
      %201 = arith.truncf %200 : vector<16x16xf32> to vector<16x16xbf16>
      %cst_79 = arith.constant dense<0.000000e+00> : vector<16x8xf32>
      %202 = tpu.matmul %201, %187, %cst_79 {dimension_numbers = #tpu.dot_dimension_numbers<[1], [0], [0], [1], [0, 0, 1, 1], [], []>} : vector<16x16xbf16>, vector<16x8xbf16>, vector<16x8xf32> -> vector<16x8xf32>
      %203 = arith.truncf %202 : vector<16x8xf32> to vector<16x8xbf16>
      %204 = arith.index_cast %109 : i32 to index
      %c24_80 = arith.constant 24 : index
      %205 = vector.load %arg13[%204, %c24_80] : memref<32x32xbf16, #tpu.memory_space<vmem>>, vector<16x8xbf16>
      tpu.vector_store %arg13[%204, %c24_80], %203 {strides = array<i32>} : memref<32x32xbf16, #tpu.memory_space<vmem>>, vector<16x8xbf16>,
    }
    %c2_i32_30 = arith.constant 2 : i32
    %c0_31 = arith.constant 0 : index
    %c0_32 = arith.constant 0 : index
    %54 = vector.load %arg13[%c0_31, %c0_32] : memref<32x32xbf16, #tpu.memory_space<vmem>>, vector<32x32xbf16>
    %c0_33 = arith.constant 0 : index
    %c0_34 = arith.constant 0 : index
    %c0_35 = arith.constant 0 : index
    %55 = vector.load %arg5[%c0_33, %c0_34, %c0_35] : memref<1x32x32xbf16, #tpu.memory_space<vmem>>, vector<1x32x32xbf16>
    %56 = vector.shape_cast %55 : vector<1x32x32xbf16> to vector<32x32xbf16>
    %cst_36 = arith.constant dense<0.000000e+00> : vector<32x32xf32>
    %57 = tpu.matmul %54, %56, %cst_36 {dimension_numbers = #tpu.dot_dimension_numbers<[1], [0], [0], [1], [0, 0, 1, 1], [], []>} : vector<32x32xbf16>, vector<32x32xbf16>, vector<32x32xf32> -> vector<32x32xf32>
    %58 = vector.broadcast %11 : vector<1x32xf32> to vector<32x32xf32>
    %59 = arith.addf %57, %58 : vector<32x32xf32>
    %60 = arith.addf %3, %59 : vector<32x32xf32>
    %cst_37 = arith.constant dense<0.000000e+00> : vector<32xf32>
    %61 = vector.multi_reduction <add>, %60, %cst_37 [1] : vector<32x32xf32> to vector<32xf32>
    %62 = vector.shape_cast %61 : vector<32xf32> to vector<32x1xf32>
    %cst_38 = arith.constant 3.200000e+01 : f32
    %63 = vector.broadcast %cst_38 : f32 to vector<32x1xf32>
    %64 = arith.divf %62, %63 : vector<32x1xf32>
    %65 = vector.broadcast %64 : vector<32x1xf32> to vector<32x32xf32>
    %66 = arith.subf %60, %65 : vector<32x32xf32>
    %67 = arith.mulf %66, %66 : vector<32x32xf32>
    %cst_39 = arith.constant dense<0.000000e+00> : vector<32xf32>
    %68 = vector.multi_reduction <add>, %67, %cst_39 [1] : vector<32x32xf32> to vector<32xf32>
    %69 = vector.shape_cast %68 : vector<32xf32> to vector<32x1xf32>
    %cst_40 = arith.constant 3.200000e+01 : f32
    %70 = vector.broadcast %cst_40 : f32 to vector<32x1xf32>
    %71 = arith.divf %69, %70 : vector<32x1xf32>
    %72 = vector.broadcast %64 : vector<32x1xf32> to vector<32x32xf32>
    %73 = arith.subf %60, %72 : vector<32x32xf32>
    %cst_41 = arith.constant 9.99999974E-6 : f32
    %74 = vector.broadcast %cst_41 : f32 to vector<32x1xf32>
    %75 = arith.addf %71, %74 : vector<32x1xf32>
    %76 = math.rsqrt %75 : vector<32x1xf32>
    %77 = vector.broadcast %76 : vector<32x1xf32> to vector<32x32xf32>
    %78 = arith.mulf %73, %77 : vector<32x32xf32>
    %79 = vector.broadcast %13 : vector<1x32xf32> to vector<32x32xf32>
    %80 = arith.mulf %78, %79 : vector<32x32xf32>
    %81 = vector.broadcast %15 : vector<1x32xf32> to vector<32x32xf32>
    %82 = arith.addf %80, %81 : vector<32x32xf32>
    %83 = arith.truncf %82 : vector<32x32xf32> to vector<32x32xbf16>
    %c0_42 = arith.constant 0 : index
    %c0_43 = arith.constant 0 : index
    %c0_44 = arith.constant 0 : index
    %84 = vector.load %arg6[%c0_42, %c0_43, %c0_44] : memref<1x32x64xbf16, #tpu.memory_space<vmem>>, vector<1x32x64xbf16>
    %85 = vector.shape_cast %84 : vector<1x32x64xbf16> to vector<32x64xbf16>
    %cst_45 = arith.constant dense<0.000000e+00> : vector<32x64xf32>
    %86 = tpu.matmul %83, %85, %cst_45 {dimension_numbers = #tpu.dot_dimension_numbers<[1], [0], [0], [1], [0, 0, 1, 1], [], []>} : vector<32x32xbf16>, vector<32x64xbf16>, vector<32x64xf32> -> vector<32x64xf32>
    %87 = vector.broadcast %17 : vector<1x64xf32> to vector<32x64xf32>
    %88 = arith.addf %86, %87 : vector<32x64xf32>
    %cst_46 = arith.constant 1.702000e+00 : f32
    %89 = vector.broadcast %cst_46 : f32 to vector<32x64xf32>
    %90 = arith.mulf %89, %88 : vector<32x64xf32>
    %91 = arith.negf %90 : vector<32x64xf32>
    %92 = math.exp %91 : vector<32x64xf32>
    %cst_47 = arith.constant 1.000000e+00 : f32
    %93 = vector.broadcast %cst_47 : f32 to vector<32x64xf32>
    %94 = arith.addf %93, %92 : vector<32x64xf32>
    %95 = arith.divf %93, %94 : vector<32x64xf32>
    %96 = arith.mulf %88, %95 : vector<32x64xf32>
    %97 = arith.truncf %96 : vector<32x64xf32> to vector<32x64xbf16>
    %c0_48 = arith.constant 0 : index
    %c0_49 = arith.constant 0 : index
    %c0_50 = arith.constant 0 : index
    %98 = vector.load %arg7[%c0_48, %c0_49, %c0_50] : memref<1x64x32xbf16, #tpu.memory_space<vmem>>, vector<1x64x32xbf16>
    %99 = vector.shape_cast %98 : vector<1x64x32xbf16> to vector<64x32xbf16>
    %cst_51 = arith.constant dense<0.000000e+00> : vector<32x32xf32>
    %100 = tpu.matmul %97, %99, %cst_51 {dimension_numbers = #tpu.dot_dimension_numbers<[1], [0], [0], [1], [0, 0, 1, 1], [], []>} : vector<32x64xbf16>, vector<64x32xbf16>, vector<32x32xf32> -> vector<32x32xf32>
    %101 = vector.broadcast %19 : vector<1x32xf32> to vector<32x32xf32>
    %102 = arith.addf %100, %101 : vector<32x32xf32>
    %103 = arith.addf %60, %102 : vector<32x32xf32>
    %c0_52 = arith.constant 0 : index
    %c0_53 = arith.constant 0 : index
    %104 = vector.load %arg11[%c0_52, %c0_53] : memref<32x32xf32, #tpu.memory_space<vmem>>, vector<32x32xf32>
    tpu.vector_store %arg11[%c0_52, %c0_53], %103 {strides = array<i32>} : memref<32x32xf32, #tpu.memory_space<vmem>>, vector<32x32xf32>,
    %c1_i32_54 = arith.constant 1 : i32
    %105 = arith.cmpi eq, %arg1, %c1_i32_54 : i32
    %106 = arith.extui %105 : i1 to i32
    %c0_i32_55 = arith.constant 0 : i32
    %107 = arith.cmpi ne, %106, %c0_i32_55 : i32
    scf.if %107 {
      %c0_56 = arith.constant 0 : index
      %c0_57 = arith.constant 0 : index
      %108 = vector.load %arg8[%c0_56, %c0_57] : memref<1x32xf32, #tpu.memory_space<vmem>>, vector<1x32xf32>
      %c0_58 = arith.constant 0 : index
      %c0_59 = arith.constant 0 : index
      %109 = vector.load %arg9[%c0_58, %c0_59] : memref<1x32xf32, #tpu.memory_space<vmem>>, vector<1x32xf32>
      %cst_60 = arith.constant dense<0.000000e+00> : vector<32xf32>
      %110 = vector.multi_reduction <add>, %103, %cst_60 [1] : vector<32x32xf32> to vector<32xf32>
      %111 = vector.shape_cast %110 : vector<32xf32> to vector<32x1xf32>
      %cst_61 = arith.constant 3.200000e+01 : f32
      %112 = vector.broadcast %cst_61 : f32 to vector<32x1xf32>
      %113 = arith.divf %111, %112 : vector<32x1xf32>
      %114 = vector.broadcast %113 : vector<32x1xf32> to vector<32x32xf32>
      %115 = arith.subf %103, %114 : vector<32x32xf32>
      %116 = arith.mulf %115, %115 : vector<32x32xf32>
      %cst_62 = arith.constant dense<0.000000e+00> : vector<32xf32>
      %117 = vector.multi_reduction <add>, %116, %cst_62 [1] : vector<32x32xf32> to vector<32xf32>
      %118 = vector.shape_cast %117 : vector<32xf32> to vector<32x1xf32>
      %cst_63 = arith.constant 3.200000e+01 : f32
      %119 = vector.broadcast %cst_63 : f32 to vector<32x1xf32>
      %120 = arith.divf %118, %119 : vector<32x1xf32>
      %121 = vector.broadcast %113 : vector<32x1xf32> to vector<32x32xf32>
      %122 = arith.subf %103, %121 : vector<32x32xf32>
      %cst_64 = arith.constant 9.99999974E-6 : f32
      %123 = vector.broadcast %cst_64 : f32 to vector<32x1xf32>
      %124 = arith.addf %120, %123 : vector<32x1xf32>
      %125 = math.rsqrt %124 : vector<32x1xf32>
      %126 = vector.broadcast %125 : vector<32x1xf32> to vector<32x32xf32>
      %127 = arith.mulf %122, %126 : vector<32x32xf32>
      %128 = vector.broadcast %108 : vector<1x32xf32> to vector<32x32xf32>
      %129 = arith.mulf %127, %128 : vector<32x32xf32>
      %130 = vector.broadcast %109 : vector<1x32xf32> to vector<32x32xf32>
      %131 = arith.addf %129, %130 : vector<32x32xf32>
      %c0_65 = arith.constant 0 : index
      %c0_66 = arith.constant 0 : index
      %132 = vector.load %arg10[%c0_65, %c0_66] : memref<32x32xf32, #tpu.memory_space<vmem>>, vector<32x32xf32>
      tpu.vector_store %arg10[%c0_65, %c0_66], %131 {strides = array<i32>} : memref<32x32xf32, #tpu.memory_space<vmem>>, vector<32x32xf32>,
    } else {
    }
    return
  }
  func.func @transform_0(%arg0: i32, %arg1: i32) -> (i32, i32) {
    %c0_i32 = arith.constant 0 : i32
    %c0_i32_0 = arith.constant 0 : i32
    return %arg0, %c0_i32 : i32, i32
  }
  func.func @transform_1(%arg0: i32, %arg1: i32) -> (i32, i32, i32) {
    %c0_i32 = arith.constant 0 : i32
    %c0_i32_0 = arith.constant 0 : i32
    %c0_i32_1 = arith.constant 0 : i32
    return %arg1, %c0_i32, %c0_i32_0 : i32, i32, i32
  }
  func.func @transform_2(%arg0: i32, %arg1: i32) -> (i32, i32, i32) {
    %c0_i32 = arith.constant 0 : i32
    %c0_i32_0 = arith.constant 0 : i32
    %c0_i32_1 = arith.constant 0 : i32
    return %arg1, %c0_i32, %c0_i32_0 : i32, i32, i32
  }
  func.func @transform_3(%arg0: i32, %arg1: i32) -> (i32, i32, i32) {
    %c0_i32 = arith.constant 0 : i32
    %c0_i32_0 = arith.constant 0 : i32
    %c0_i32_1 = arith.constant 0 : i32
    return %arg1, %c0_i32, %c0_i32_0 : i32, i32, i32
  }
  func.func @transform_4(%arg0: i32, %arg1: i32) -> (i32, i32, i32) {
    %c0_i32 = arith.constant 0 : i32
    %c0_i32_0 = arith.constant 0 : i32
    %c0_i32_1 = arith.constant 0 : i32
    return %arg1, %c0_i32, %c0_i32_0 : i32, i32, i32
  }
  func.func @transform_5(%arg0: i32, %arg1: i32) -> (i32, i32, i32) {
    %c0_i32 = arith.constant 0 : i32
    %c0_i32_0 = arith.constant 0 : i32
    %c0_i32_1 = arith.constant 0 : i32
    return %arg1, %c0_i32, %c0_i32_0 : i32, i32, i32
  }
  func.func @transform_6(%arg0: i32, %arg1: i32) -> (i32, i32) {
    %c0_i32 = arith.constant 0 : i32
    %c0_i32_0 = arith.constant 0 : i32
    %c0_i32_1 = arith.constant 0 : i32
    return %c0_i32, %c0_i32_0 : i32, i32
  }
  func.func @transform_7(%arg0: i32, %arg1: i32) -> (i32, i32) {
    %c0_i32 = arith.constant 0 : i32
    %c0_i32_0 = arith.constant 0 : i32
    %c0_i32_1 = arith.constant 0 : i32
    return %c0_i32, %c0_i32_0 : i32, i32
  }
  func.func @transform_8(%arg0: i32, %arg1: i32) -> (i32, i32) {
    %c0_i32 = arith.constant 0 : i32
    %c0_i32_0 = arith.constant 0 : i32
    return %arg0, %c0_i32 : i32, i32
  }
}

</mosaic_0001>

<bundles_post_ra>
// kernel: clip_text_transformer.1
= control target key start
LH: loop header
LB: loop body
LE: loop exit
PB: predicated region body
PF: predicated region fallthrough
CT: control target
= control target key end

     0   :  { %s1923_s27 = smov 0   ;;  %s1925_s28 = smov 0   ;;  %s2311_s0 = inlined_call_operand.vmem [shape: f32[32,32], index: 0, kind: input, shape index: {}]   ;;  %s2312_s1 = inlined_call_operand.vmem [shape: f32[2,8,96], index: 1, kind: input, shape index: {}]   ;;  %s2313_s2 = inlined_call_operand.vmem [shape: bf16[2,32,96], index: 2, kind: input, shape index: {}]   ;;  %s2314_s3 = inlined_call_operand.vmem [shape: bf16[2,32,32], index: 3, kind: input, shape index: {}]   ;;  %s2315_s4 = inlined_call_operand.vmem [shape: bf16[2,32,64], index: 4, kind: input, shape index: {}]   ;;  %s2316_s5 = inlined_call_operand.vmem [shape: bf16[2,64,32], index: 5, kind: input, shape index: {}]   ;;  %s2317_s6 = inlined_call_operand.vmem [shape: f32[1,32], index: 6, kind: input, shape index: {}]   ;;  %s2318_s7 = inlined_call_operand.vmem [shape: f32[1,32], index: 7, kind: input, shape index: {}]   ;;  %s2319_s8 = inlined_call_operand.vmem [shape: f32[32,32], index: 8, kind: output, shape index: {}]  }
   0x1   :  { %s1927_s29 = smov 0  }
   0x2 LB: > { %s27_s30 = sadd.s32 1, %s1853_s28  ;;  %p1576_p0 = scmp.ge.s32.totalorder %s1857_s29, 1  ;;  %s1857_s29 = sphi %s1927_s29, %s18_s29   ;;  %s1853_s28 = sphi %s1925_s28, %s2321_s28   ;;  %s1849_s27 = sphi %s1923_s27, %s2320_s27  }
   0x3   : > { %p28_p1 = scmp.ge.s32.totalorder %s27_s30, 2  ;;  %p324_p2 = scmp.lt.s32.totalorder %s1857_s29, 3 }
   0x5   : > { %s2323_s30 = smov (%p28_p1, %s27_s30), 0  ;;  %p325_p3 = pnand %p1576_p0, %p324_p2 }
   0x6   : > { %p388_p4 = scmp.lt.s32.totalorder (!%p325_p3), %s1849_s27, 1  ;;  %p1586_p5 = scmp.ne.s32.totalorder (!%p325_p3), %s1849_s27, 0 }
   0x7   : > { %328 = sbr.rel (%p325_p3) target bundleno = 2688 (0xa80), region = 52 }
   0xc   : > { %s389_s9 = scalar_select %p388_p4, %s1849_s27, 1 }
   0xe   : > { %s1577_s10 = sshll.u32 %s389_s9, 3  ;;  %s1679_s11 = sshll.u32 %s389_s9, 4 }
   0xf   : > { %s1948_s14 = scalar_lea.vmem %s2312_s1, %s1577_s10  ;;  %s1953_s17 = scalar_lea.vmem %s2313_s2, %s1679_s11 }
  0x10   : > { %s1958_s20 = scalar_lea.vmem %s2314_s3, %s1679_s11  ;;  %s1963_s23 = scalar_lea.vmem %s2315_s4, %s1679_s11 }
  0x11   : > { %s1682_s24 = sshll.u32 %s389_s9, 5  ;;  %422 = sbr.rel (%p1586_p5) target bundleno = 27 (0x1b), region = 56 }
  0x12   : > { %s1968_s10 = scalar_lea.vmem %s2316_s5, %s1682_s24 }
  0x16   : > { %v423_v0 = vld [vmem:[%s2311_s0] sm:$0xff]  ;;  %vm427_vm0 = vcmask 261120   ;;  %v424_v1 = vld [vmem:[%s2311_s0 + $0x8] sm:$0xff]  ;;  %v425_v2 = vld [vmem:[%s2311_s0 + $0x10] sm:$0xff] }
  0x17   : > { %428 = vst.msk [vmem:[#allocation2] sm:$0xff] %vm427_vm0, %v423_v0  ;;  %v426_v3 = vld [vmem:[%s2311_s0 + $0x18] sm:$0xff] }
  0x18   : > { %429 = vst.msk [vmem:[#allocation2 + $0x8] sm:$0xff] %vm427_vm0, %v424_v1 }
  0x19   : > { %430 = vst.msk [vmem:[#allocation2 + $0x10] sm:$0xff] %vm427_vm0, %v425_v2 }
  0x1a   : > { %431 = vst.msk [vmem:[#allocation2 + $0x18] sm:$0xff] %vm427_vm0, %v426_v3 }
  0x1b PF: > { %vm444_vm1 = vcmask 261120   ;;  %v1863_v12 = vmov 32.0   ;;  %v1684_v39 = vld [vmem:[%s1953_s17 + $0x8] sm:$0xff]  ;;  %v2031_v42 = vld [vmem:[%s1948_s14 + $0x3] sm:$0x1] }
  0x1c   : > { %1755 = vrcp.f32 %v1863_v12  ;;  %v2034_v43 = vld [vmem:[%s1948_s14 + $0x4] sm:$0x1]  ;;  %v2037_v44 = vld [vmem:[%s1948_s14 + $0x5] sm:$0x1]  ;;  %v2042_v47 = vld [vmem:[%s1948_s14 + $0x6] sm:$0x1]  ;;  %581 = vmatpush.bf16.msra.mxu0 %v1684_v39  ;;  %1699 = vmatpush.bf16.msra.mxu1 %v1684_v39 }
  0x1d   : > { %v2045_v48 = vld [vmem:[%s1948_s14 + $0x7] sm:$0x1] }
  0x1e   : > { %v1985_v5 = vld [vmem:[#allocation2] sm:$0xff] }
  0x1f   : > { %v445_v7 = vsel %vm444_vm1, %v1985_v5, 0.0  ;;  %v1993_v9 = vld [vmem:[#allocation2 + $0x8] sm:$0xff]  ;;  %v1683_v49 = vld [vmem:[%s1953_s17] sm:$0xff]  ;;  %s2070_s17 = smov 0  }
  0x20   : > { %v1983_v4 = vld [vmem:[#allocation2 + $0x10] sm:$0xff]  ;;  %446 = vadd.xlane.f32.xlu0 %v445_v7  ;;  %v448_v11 = vsel %vm444_vm1, %v1993_v9, 0.0  ;;  %582 = vmatpush.bf16.msra.mxu0 %v1683_v49 }
  0x21   : > { %v451_v6 = vsel %vm444_vm1, %v1983_v4, 0.0  ;;  %v1991_v8 = vld [vmem:[#allocation2 + $0x18] sm:$0xff]  ;;  %1700 = vmatpush.bf16.msra.mxu1 %v1683_v49 }
  0x22   : > { %452 = vadd.xlane.f32.xlu1 %v451_v6  ;;  %v454_v10 = vsel %vm444_vm1, %v1991_v8, 0.0  ;;  %v1756_v13 = vpop.eup %1755 }
  0x23   : > { %v458_v14 = vmul.f32 32.0, %v1756_v13  ;;  %vm462_vm2 = vweird.f32 %v1756_v13 }
  0x25   : > { %v459_v15 = vsub.f32 1.0, %v458_v14 }
  0x27   : > { %v460_v16 = vmul.f32 %v1756_v13, %v459_v15 }
  0x28   : > { %449 = vadd.xlane.f32.xlu0 %v448_v11 }
  0x29   : > { %v461_v17 = vadd.f32 %v1756_v13, %v460_v16 }
  0x2a   : > { %455 = vadd.xlane.f32.xlu1 %v454_v10 }
  0x2b   : > { %v1999_v18 = vsel %vm462_vm2, %v1756_v13, %v461_v17  ;;  %vm598_vm2 = vcmask 781312  }
  0x93   : > { %v447_v20 = vpop.xlane.xlu0 %446 }
  0x94   : > { %v464_v22 = vmul.f32 %v1999_v18, %v447_v20 }
  0x95   : > { %v453_v19 = vpop.xlane.xlu1 %452 }
  0x96   : > { %v466_v21 = vmul.f32 %v1999_v18, %v453_v19  ;;  %v2007_v24 = vsub.f32 %v1985_v5, %v464_v22 }
  0x98   : > { %v2004_v23 = vsub.f32 %v1983_v4, %v466_v21  ;;  %v472_v26 = vmul.f32 %v2007_v24, %v2007_v24 }
  0x9a   : > { %v474_v25 = vmul.f32 %v2004_v23, %v2004_v23  ;;  %v476_v28 = vsel %vm444_vm1, %v472_v26, 0.0  ;;  %v1752_v26 = vld [vmem:[%s1948_s14] ss:$0 sm:$0xff] }
  0x9b   : > { %477 = vadd.xlane.f32.xlu2 %v476_v28  ;;  %v450_v30 = vpop.xlane.xlu0 %449 }
  0x9c   : > { %v482_v27 = vsel %vm444_vm1, %v474_v25, 0.0  ;;  %v465_v32 = vmul.f32 %v1999_v18, %v450_v30 }
  0x9d   : > { %v456_v29 = vpop.xlane.xlu1 %455  ;;  %483 = vadd.xlane.f32.xlu0 %v482_v27 }
  0x9e   : > { %v467_v31 = vmul.f32 %v1999_v18, %v456_v29  ;;  %v2021_v34 = vsub.f32 %v1993_v9, %v465_v32 }
  0xa0   : > { %v2018_v33 = vsub.f32 %v1991_v8, %v467_v31  ;;  %v473_v36 = vmul.f32 %v2021_v34, %v2021_v34 }
  0xa2   : > { %v475_v35 = vmul.f32 %v2018_v33, %v2018_v33  ;;  %v479_v38 = vsel %vm444_vm1, %v473_v36, 0.0 }
  0xa3   : > { %480 = vadd.xlane.f32.xlu2 %v479_v38 }
  0xa4   : > { %v485_v37 = vsel %vm444_vm1, %v475_v35, 0.0  ;;  %v1753_v35 = vld [vmem:[%s1948_s14 + $0x1] ss:$0 sm:$0xff] }
  0xa5   : > { %486 = vadd.xlane.f32.xlu1 %v485_v37 }
 0x10e   : > { %v478_v40 = vpop.xlane.xlu2 %477 }
 0x10f   : > { %v488_v45 = vmul.f32 %v478_v40, %v1999_v18 }
 0x110   : > { %v484_v41 = vpop.xlane.xlu0 %483 }
 0x111   : > { %v490_v46 = vmul.f32 %v484_v41, %v1999_v18  ;;  %v492_v50 = vadd.f32 1e-05, %v488_v45 }
 0x113   : > { %v494_v51 = vadd.f32 1e-05, %v490_v46  ;;  %1757 = vrsqrt.f32 %v492_v50  ;;  %vm502_vm6 = vweird.f32 %v492_v50 }
 0x115   : > { %1759 = vrsqrt.f32 %v494_v51  ;;  %vm522_vm5 = vweird.f32 %v494_v51 }
 0x116   : > { %v481_v53 = vpop.xlane.xlu2 %480 }
 0x117   : > { %v489_v55 = vmul.f32 %v481_v53, %v1999_v18 }
 0x118   : > { %v487_v52 = vpop.xlane.xlu1 %486 }
 0x119   : > { %v491_v54 = vmul.f32 %v487_v52, %v1999_v18  ;;  %v1758_v56 = vpop.eup %1757  ;;  %v493_v58 = vadd.f32 1e-05, %v489_v55  ;;  %v1754_v52 = vld [vmem:[%s1948_s14 + $0x2] ss:$0 sm:$0xff] }
 0x11a   : > { %v497_v60 = vmul.f32 %v1758_v56, %v492_v50  ;;  %vm503_vm4 = vweird.f32 %v1758_v56 }
 0x11b   : > { %v495_v57 = vadd.f32 1e-05, %v491_v54  ;;  %v1760_v59 = vpop.eup %1759  ;;  %vm504_vm8 = vmor %vm502_vm6, %vm503_vm4  ;;  %vm512_vm13 = vweird.f32 %v493_v58 }
 0x11c   : > { %v517_v61 = vmul.f32 %v1760_v59, %v494_v51  ;;  %v498_v62 = vmul.f32 %v1758_v56, %v497_v60  ;;  %vm523_vm3 = vweird.f32 %v1760_v59 }
 0x11d   : > { %1761 = vrsqrt.f32 %v495_v57  ;;  %vm524_vm7 = vmor %vm522_vm5, %vm523_vm3  ;;  %vm532_vm11 = vweird.f32 %v495_v57 }
 0x11e   : > { %1763 = vrsqrt.f32 %v493_v58  ;;  %v518_v63 = vmul.f32 %v1760_v59, %v517_v61  ;;  %v499_v0 = vmul.f32 0.5, %v498_v62 }
 0x120   : > { %v519_v1 = vmul.f32 0.5, %v518_v63  ;;  %v500_v2 = vsub.f32 1.5, %v499_v0 }
 0x122   : > { %v520_v6 = vsub.f32 1.5, %v519_v1  ;;  %v501_v11 = vmul.f32 %v1758_v56, %v500_v2 }
 0x123   : > { %v1762_v3 = vpop.eup %1761 }
 0x124   : > { %v1764_v7 = vpop.eup %1763  ;;  %v527_v10 = vmul.f32 %v1762_v3, %v495_v57  ;;  %v521_v12 = vmul.f32 %v1760_v59, %v520_v6  ;;  %v505_v19 = vsel %vm504_vm8, %v1758_v56, %v501_v11  ;;  %vm533_vm9 = vweird.f32 %v1762_v3 }
 0x125   : > { %v507_v13 = vmul.f32 %v1764_v7, %v493_v58  ;;  %vm513_vm10 = vweird.f32 %v1764_v7  ;;  %v536_v27 = vmul.f32 %v505_v19, %v2007_v24  ;;  %vm534_vm12 = vmor %vm532_vm11, %vm533_vm9 }
 0x126   : > { %v528_v14 = vmul.f32 %v1762_v3, %v527_v10  ;;  %v525_v16 = vsel %vm524_vm7, %v1760_v59, %v521_v12  ;;  %vm514_vm14 = vmor %vm512_vm13, %vm513_vm10 }
 0x127   : > { %v508_v15 = vmul.f32 %v1764_v7, %v507_v13  ;;  %v538_v22 = vmul.f32 %v525_v16, %v2004_v23  ;;  %v541_v23 = vmul.f32 %v1752_v26, %v536_v27 }
 0x128   : > { %v529_v17 = vmul.f32 0.5, %v528_v14 }
 0x129   : > { %v509_v20 = vmul.f32 0.5, %v508_v15  ;;  %v543_v36 = vmul.f32 %v1752_v26, %v538_v22  ;;  %v546_v41 = vadd.f32 %v1753_v35, %v541_v23 }
 0x12a   : > { %v530_v21 = vsub.f32 1.5, %v529_v17 }
 0x12b   : > { %v510_v25 = vsub.f32 1.5, %v509_v20  ;;  %v548_v40 = vadd.f32 %v1753_v35, %v543_v36 }
 0x12c   : > { %v531_v28 = vmul.f32 %v1762_v3, %v530_v21 }
 0x12d   : > { %v511_v29 = vmul.f32 %v1764_v7, %v510_v25 }
 0x12e   : > { %v535_v30 = vsel %vm534_vm12, %v1762_v3, %v531_v28 }
 0x12f   : > { %v539_v31 = vmul.f32 %v535_v30, %v2018_v33  ;;  %v515_v32 = vsel %vm514_vm14, %v1764_v7, %v511_v29  ;;  %v603_v33 = vlaneseq }
 0x130   : > { %v537_v37 = vmul.f32 %v515_v32, %v2021_v34 }
 0x131   : > { %v544_v38 = vmul.f32 %v1752_v26, %v539_v31  ;;  %v2058_v50 = vshrl.u32 %v603_v33, 7  ;;  %v2063_v34 = vand.u32 127, %v603_v33 }
 0x132   : > { %v542_v39 = vmul.f32 %v1752_v26, %v537_v37 }
 0x133   : > { %v549_v24 = vadd.f32 %v1753_v35, %v544_v38  ;;  %v2061_v51 = vadd.s32 8, %v2058_v50  ;;  %vm608_vm15 = vcmp.le.s32.totalorder %v2063_v34, %v2058_v50 }
 0x134   : > { %v547_v45 = vadd.f32 %v1753_v35, %v542_v39 }
 0x135   : > { %v551_v46 = vpack.c.bf16 %v549_v24, %v548_v40  ;;  %vm609_vm0 = vcmp.le.s32.totalorder %v2063_v34, %v2061_v51 }
 0x136   : > { %v550_v49 = vpack.c.bf16 %v547_v45, %v546_v41 }
 0x137   : > { %1596 = vmatmul.msk.bf16.vlgmr.msra.gmra.mxu1 %vm444_vm1, %v551_v46 }
 0x138   : > { %1595 = vmatmul.msk.bf16.vlgmr.msra.gmra.mxu0 %vm444_vm1, %v550_v49 }
 0x1b4   : > { %v589_v53 = vpop.f32.mrf.mxu1 }
 0x1b5   : > { %v584_v54 = vpop.f32.mrf.mxu0  ;;  %v590_v55 = vadd.f32 %v1754_v52, %v589_v53 }
 0x1b6   : > { %v585_v56 = vadd.f32 %v1754_v52, %v584_v54 }
 0x1b7   : > { %v596_v57 = vpack.c.bf16 %v590_v55, %v590_v55 }
 0x1b8   : > { %v594_v58 = vpack.c.bf16 %v585_v56, %v585_v56 }
 0x1b9   : > { %601 = vst.msk [vmem:[#allocation3 + $0x8] sm:$0xf] %vm598_vm2, %v596_v57 }
 0x1ba   : > { %599 = vst.msk [vmem:[#allocation3] sm:$0xf] %vm598_vm2, %v594_v58 }
 0x1bc   : > { %v591_v59 = vpop.f32.mrf.mxu1 }
 0x1bd   : > { %v586_v60 = vpop.f32.mrf.mxu0  ;;  %v592_v61 = vadd.f32 %v1754_v52, %v591_v59 }
 0x1be   : > { %v587_v62 = vadd.f32 %v1754_v52, %v586_v60 }
 0x1bf   : > { %v597_v63 = vpack.c.bf16 %v592_v61, %v592_v61 }
 0x1c0   : > { %v595_v0 = vpack.c.bf16 %v587_v62, %v587_v62 }
 0x1c1   : > { %602 = vst.msk [vmem:[#allocation3 + $0xc] sm:$0xf] %vm598_vm2, %v597_v63 }
 0x1c2   : > { %600 = vst.msk [vmem:[#allocation3 + $0x4] sm:$0xf] %vm598_vm2, %v595_v0 }
 0x1c3 LB: >> { %s1597_s14 = sshll.u32 %s1861_s17, 4  ;;  %s1864_s25 = smov 96   ;;  %vm630_vm3 = vcmask 64512   ;;  %vm653_vm4 = vcmask 130048   ;;  %vm701_vm5 = vcmask 60416   ;;  %vm790_vm6 = vcmask 126016   ;;  %s1861_s17 = sphi %s2070_s17, %s615_s17  }
 0x1c4   : >> { %s2076_s21 = sshra.s32 %s1597_s14, 3  ;;  %s1865_s26 = smov 120   ;;  %vm879_vm7 = vcmask 191616   ;;  %vm968_vm8 = vcmask 257216  }
 0x1c5   : >> { %s1598_s22 = sshll.u32 %s2076_s21, 2  ;;  %s1866_s12 = smov 80  }
 0x1c6   : >> { %s620_s24 = scalar_lea.vmem [#allocation3], %s1598_s22  ;;  %s1867_s13 = smov 88  }
 0x1c7   : >> { %s1868_s15 = smov 64   ;;  %s1869_s16 = smov 72  }
 0x1c8   : >> { %s1870_s11 = smov 104   ;;  %s1871_s18 = smov 112  }
 0x1c9   : >> { %v1685_v1 = vld [vmem:[%s620_s24] sm:$0xff]  ;;  %s1872_s9 = smov 56   ;;  %s2131_s19 = scalar_lea.vmem [#allocation4], %s1598_s22 }
 0x1ca   : >> { %628 = vrot.lane.b32.xlu0 %v1685_v1, %s1864_s25  ;;  %v2083_v6 = vld [vmem:[%s620_s24] sm:$0xff]  ;;  %s1873_s14 = smov 48   ;;  %s1874_s21 = smov 40  }
 0x1cb   : >> { %711 = vrot.lane.b32.xlu2 %v2083_v6, %s1865_s26  ;;  %v2094_v15 = vld [vmem:[%s620_s24] sm:$0xff]  ;;  %s1875_s22 = smov 8   ;;  %s1877_s25 = smov 24  }
 0x1cc   : >> { %v2098_v16 = vld [vmem:[%s620_s24] sm:$0xff]  ;;  %s1876_s24 = smov 16   ;;  %s615_s17 = sadd.s32 1, %s1861_s17  }
 0x1cd   : >> { %p612_p6 = scmp.ge.s32.totalorder %s615_s17, 2  }
 0x1ce   : > { %p1674_p7 = scmp.ne.s32.totalorder (%p612_p6), %s1849_s27, 1 }
 0x1d3   : >> { %802 = vrot.lane.b32.xlu2 %v2094_v15, %s1866_s12 }
 0x225   : >> { %v712_v30 = vpop.permute.xlu2 %711 }
 0x22d   : >> { %v803_v35 = vpop.permute.xlu2 %802 }
 0x22e   : >> { %v808_v36 = vsel %vm630_vm3, %v803_v35, 0 }
 0x23c   : >> { %v629_v2 = vpop.permute.xlu0 %628 }
 0x23d   : >> { %v635_v3 = vsel %vm630_vm3, %v629_v2, 0 }
 0x23e   : >> { %644 = vmatpush.bf16.xpose.msra.mxu0 %v635_v3 }
 0x245   : >> { %1603 = vmatmul.msk.bf16.vlgmr.msra.gmra.mxu0 %vm630_vm3, %v1685_v1 }
 0x2c2   : >> { %v646_v7 = vpop.f32.mrf.mxu0 }
 0x2c3   : >> { %v651_v10 = vsel %vm608_vm15, %v646_v7, -1e+09 }
 0x2c4   : >> { %v654_v11 = vsel %vm653_vm4, %v651_v10, -inf }
 0x2c5   : >> { %655 = vmax.xlane.f32.xlu0 %v654_v11 }
 0x2ca   : >> { %v648_v12 = vpop.f32.mrf.mxu0 }
 0x2cb   : >> { %v652_v13 = vsel %vm609_vm0, %v648_v12, -1e+09 }
 0x2cc   : >> { %v657_v14 = vsel %vm653_vm4, %v652_v13, -inf }
 0x2cd   : >> { %658 = vmax.xlane.f32.xlu1 %v657_v14 }
 0x2e6   : >> { %713 = vrot.lane.b32.xlu1 %v2083_v6, %s1867_s13 }
 0x2ee   : >> { %677 = vrot.lane.b32.xlu1 %v1685_v1, %s1868_s15 }
 0x2f6   : >> { %891 = vrot.lane.b32.xlu1 %v2098_v16, %s1869_s16 }
 0x2fe   : >> { %889 = vrot.lane.b32.xlu1 %v2098_v16, %s1870_s11 }
 0x338   : >> { %v656_v17 = vpop.xlane.xlu0 %655 }
 0x339   : >> { %v660_v19 = vsub.f32 %v651_v10, %v656_v17 }
 0x33b   : >> { %v662_v20 = vmul.f32 1.442695, %v660_v19 }
 0x33d   : >> { %1765 = vpow2.f32 %v662_v20 }
 0x340   : >> { %v659_v21 = vpop.xlane.xlu1 %658 }
 0x341   : >> { %v661_v22 = vsub.f32 %v652_v13, %v659_v21 }
 0x343   : >> { %v1766_v25 = vpop.eup %1765  ;;  %v664_v26 = vmul.f32 1.442695, %v661_v22 }
 0x344   : >> { %v666_v27 = vsel %vm653_vm4, %v1766_v25, 0.0 }
 0x345   : >> { %1767 = vpow2.f32 %v664_v26  ;;  %667 = vadd.xlane.f32.xlu2 %v666_v27 }
 0x34b   : >> { %v1768_v28 = vpop.eup %1767 }
 0x34c   : >> { %v669_v29 = vsel %vm653_vm4, %v1768_v28, 0.0 }
 0x34d   : >> { %670 = vadd.xlane.f32.xlu2 %v669_v29 }
 0x358   : >> { %v714_v31 = vpop.permute.xlu1 %713 }
 0x359   : >> { %v719_v32 = vsel %vm630_vm3, %v714_v31, 0 }
 0x35a   : >> { %728 = vmatpush.bf16.xpose.msra.mxu2 %v719_v32 }
 0x360   : >> { %v678_v37 = vpop.permute.xlu1 %677 }
 0x361   : >> { %1610 = vmatmul.msk.bf16.vlgmr.msra.gmra.mxu2 %vm630_vm3, %v712_v30  ;;  %690 = vmatpush.bf16.msra.mxu1 %v678_v37 }
 0x365   : >> { %817 = vmatpush.bf16.xpose.msrb.mxu1 %v808_v36  ;;  %800 = vrot.lane.b32.xlu2 %v2094_v15, %s1871_s18 }
 0x368   : >> { %v892_v23 = vpop.permute.xlu1 %891 }
 0x369   : >> { %v897_v38 = vsel %vm630_vm3, %v892_v23, 0 }
 0x36a   : >> { %906 = vmatpush.bf16.xpose.msrb.mxu0 %v897_v38 }
 0x370   : >> { %v890_v39 = vpop.permute.xlu1 %889 }
 0x371   : >> { %1622 = vmatmul.msk.bf16.vlgmr.msrb.gmra.mxu0 %vm630_vm3, %v890_v39 }
 0x3b8   : >> { %v668_v40 = vpop.xlane.xlu2 %667 }
 0x3b9   : >> { %1769 = vrcp.f32 %v668_v40 }
 0x3bf   : >> { %v1770_v41 = vpop.eup %1769 }
 0x3c0   : >> { %v671_v24 = vpop.xlane.xlu2 %670  ;;  %v674_v46 = vmul.f32 %v1770_v41, %v1766_v25 }
 0x3c1   : >> { %1771 = vrcp.f32 %v671_v24 }
 0x3c7   : >> { %v1772_v45 = vpop.eup %1771 }
 0x3c8   : >> { %v675_v49 = vmul.f32 %v1772_v45, %v1768_v28  ;;  %v801_v52 = vpop.permute.xlu2 %800 }
 0x3ca   : >> { %v676_v33 = vpack.c.bf16 %v675_v49, %v674_v46 }
 0x3cc   : >> { %1604 = vmatmul.msk.bf16.vlgmr.msra.gmra.mxu1 %vm653_vm4, %v676_v33 }
 0x3dc   : >> { %1616 = vmatmul.msk.bf16.vlgmr.msrb.gmra.mxu1 %vm630_vm3, %v801_v52 }
 0x3e4   : >> { %v730_v53 = vpop.f32.mrf.mxu2 }
 0x3e5   : >> { %v735_v54 = vsel %vm608_vm15, %v730_v53, -1e+09 }
 0x3e6   : >> { %v737_v55 = vsel %vm653_vm4, %v735_v54, -inf }
 0x3e7   : >> { %738 = vmax.xlane.f32.xlu0 %v737_v55 }
 0x3ec   : >> { %v732_v56 = vpop.f32.mrf.mxu2 }
 0x3ed   : >> { %v736_v57 = vsel %vm609_vm0, %v732_v56, -1e+09 }
 0x3ee   : >> { %v908_v58 = vpop.f32.mrf.mxu0  ;;  %v740_v59 = vsel %vm653_vm4, %v736_v57, -inf }
 0x3ef   : >> { %v913_v60 = vsel %vm608_vm15, %v908_v58, -1e+09  ;;  %741 = vmax.xlane.f32.xlu2 %v740_v59 }
 0x3f0   : >> { %v915_v61 = vsel %vm653_vm4, %v913_v60, -inf }
 0x3f1   : >> { %916 = vmax.xlane.f32.xlu0 %v915_v61 }
 0x3f6   : >> { %v910_v62 = vpop.f32.mrf.mxu0 }
 0x3f7   : >> { %v914_v63 = vsel %vm609_vm0, %v910_v62, -1e+09 }
 0x3f8   : >> { %v918_v0 = vsel %vm653_vm4, %v914_v63, -inf }
 0x3f9   : >> { %919 = vmax.xlane.f32.xlu0 %v918_v0 }
 0x407   : >> { %760 = vrot.lane.b32.xlu2 %v2083_v6, %s1872_s9 }
 0x449   : >> { %v692_v1 = vpop.f32.mrf.mxu1 }
 0x44a   : >> { %v697_v2 = vpack.c.bf16 %v692_v1, %v692_v1 }
 0x44c   : >> { %702 = vst.msk [vmem:[%s2131_s19] sm:$0xf] %vm701_vm5, %v697_v2 }
 0x451   : >> { %v694_v3 = vpop.f32.mrf.mxu1 }
 0x452   : >> { %v698_v7 = vpack.c.bf16 %v694_v3, %v694_v3 }
 0x454   : >> { %703 = vst.msk [vmem:[%s2131_s19 + $0x4] sm:$0xf] %vm701_vm5, %v698_v7 }
 0x459   : >> { %v819_v10 = vpop.f32.mrf.mxu1 }
 0x45a   : >> { %v824_v11 = vsel %vm608_vm15, %v819_v10, -1e+09  ;;  %v739_v12 = vpop.xlane.xlu0 %738 }
 0x45b   : >> { %v743_v13 = vsub.f32 %v735_v54, %v739_v12  ;;  %v826_v6 = vsel %vm653_vm4, %v824_v11, -inf }
 0x45c   : >> { %827 = vmax.xlane.f32.xlu1 %v826_v6 }
 0x45d   : >> { %v745_v14 = vmul.f32 1.442695, %v743_v13 }
 0x45f   : >> { %1773 = vpow2.f32 %v745_v14 }
 0x461   : >> { %v821_v25 = vpop.f32.mrf.mxu1 }
 0x462   : >> { %v742_v17 = vpop.xlane.xlu2 %741  ;;  %v825_v27 = vsel %vm609_vm0, %v821_v25, -1e+09 }
 0x463   : >> { %v744_v21 = vsub.f32 %v736_v57, %v742_v17  ;;  %v829_v31 = vsel %vm653_vm4, %v825_v27, -inf }
 0x464   : >> { %v917_v19 = vpop.xlane.xlu0 %916 }
 0x465   : >> { %v1774_v20 = vpop.eup %1773  ;;  %v747_v26 = vmul.f32 1.442695, %v744_v21  ;;  %v921_v29 = vsub.f32 %v913_v60, %v917_v19 }
 0x466   : >> { %v749_v22 = vsel %vm653_vm4, %v1774_v20, 0.0 }
 0x467   : >> { %750 = vadd.xlane.f32.xlu0 %v749_v22  ;;  %1775 = vpow2.f32 %v747_v26  ;;  %v923_v35 = vmul.f32 1.442695, %v921_v29 }
 0x46a   : >> { %v761_v46 = vpop.permute.xlu2 %760 }
 0x46b   : >> { %773 = vmatpush.bf16.msra.mxu3 %v761_v46 }
 0x46c   : >> { %v920_v28 = vpop.xlane.xlu0 %919 }
 0x46d   : >> { %v922_v30 = vsub.f32 %v914_v63, %v920_v28  ;;  %v1776_v36 = vpop.eup %1775 }
 0x46e   : >> { %v752_v37 = vsel %vm653_vm4, %v1776_v36, 0.0 }
 0x46f   : >> { %v925_v32 = vmul.f32 1.442695, %v922_v30  ;;  %830 = vmax.xlane.f32.xlu0 %v829_v31 }
 0x471   : >> { %1777 = vpow2.f32 %v925_v32 }
 0x472   : >> { %1779 = vpow2.f32 %v923_v35 }
 0x477   : >> { %v1778_v23 = vpop.eup %1777  ;;  %753 = vadd.xlane.f32.xlu0 %v752_v37 }
 0x478   : >> { %v930_v38 = vsel %vm653_vm4, %v1778_v23, 0.0  ;;  %v1780_v39 = vpop.eup %1779 }
 0x479   : >> { %931 = vadd.xlane.f32.xlu1 %v930_v38  ;;  %v927_v40 = vsel %vm653_vm4, %v1780_v39, 0.0 }
 0x47f   : >> { %928 = vadd.xlane.f32.xlu0 %v927_v40 }
 0x4cf   : >> { %v828_v24 = vpop.xlane.xlu1 %827 }
 0x4d0   : >> { %v832_v41 = vsub.f32 %v824_v11, %v828_v24 }
 0x4d2   : >> { %v834_v45 = vmul.f32 1.442695, %v832_v41  ;;  %v1692_v41 = vld [vmem:[%s1958_s20 + $0x8] sm:$0xff] (%p612_p6) }
 0x4d3   : > { %1014 = vmatpush.bf16.msra.mxu0 (%p612_p6), %v1692_v41 }
 0x4d4   : >> { %1781 = vpow2.f32 %v834_v45  ;;  %v1691_v45 = vld [vmem:[%s1958_s20] sm:$0xff] (%p612_p6) }
 0x4d7   : > { %1015 = vmatpush.bf16.msra.mxu0 (%p612_p6), %v1691_v45 }
 0x4da   : >> { %v1782_v49 = vpop.eup %1781  ;;  %v751_v33 = vpop.xlane.xlu0 %750 }
 0x4db   : >> { %v838_v52 = vsel %vm653_vm4, %v1782_v49, 0.0 }
 0x4dc   : >> { %839 = vadd.xlane.f32.xlu0 %v838_v52 }
 0x4e2   : >> { %v831_v53 = vpop.xlane.xlu0 %830 }
 0x4e3   : >> { %v833_v54 = vsub.f32 %v825_v27, %v831_v53 }
 0x4e5   : >> { %v836_v55 = vmul.f32 1.442695, %v833_v54 }
 0x4e7   : >> { %1783 = vpow2.f32 %v836_v55 }
 0x4e8   : >> { %1785 = vrcp.f32 %v751_v33  ;;  %v979_v33 = vperm.slane (%p612_p6), %v2031_v42, 0 }
 0x4ea   : >> { %v754_v56 = vpop.xlane.xlu0 %753 }
 0x4eb   : >> { %1787 = vrcp.f32 %v754_v56 }
 0x4ec   : >> { %v932_v1 = vpop.xlane.xlu1 %931 }
 0x4ed   : >> { %v1784_v57 = vpop.eup %1783 }
 0x4ee   : >> { %v841_v58 = vsel %vm653_vm4, %v1784_v57, 0.0  ;;  %v1786_v59 = vpop.eup %1785 }
 0x4ef   : >> { %842 = vadd.xlane.f32.xlu1 %v841_v58  ;;  %v757_v61 = vmul.f32 %v1786_v59, %v1774_v20 }
 0x4f0   : >> { %849 = vrot.lane.b32.xlu0 %v2094_v15, %s1873_s14 }
 0x4f1   : >> { %v1788_v60 = vpop.eup %1787 }
 0x4f2   : >> { %v758_v62 = vmul.f32 %v1788_v60, %v1776_v36  ;;  %v929_v0 = vpop.xlane.xlu0 %928 }
 0x4f4   : >> { %v759_v63 = vpack.c.bf16 %v758_v62, %v757_v61 }
 0x4f6   : >> { %1611 = vmatmul.msk.bf16.vlgmr.msra.gmra.mxu3 %vm653_vm4, %v759_v63 }
 0x508   : >> { %938 = vrot.lane.b32.xlu1 %v2098_v16, %s1874_s21 }
 0x54f   : >> { %v840_v2 = vpop.xlane.xlu0 %839 }
 0x550   : >> { %1789 = vrcp.f32 %v840_v2 }
 0x556   : >> { %v1790_v10 = vpop.eup %1789 }
 0x557   : >> { %v846_v15 = vmul.f32 %v1790_v10, %v1782_v49 }
 0x562   : >> { %v843_v3 = vpop.xlane.xlu1 %842  ;;  %v850_v7 = vpop.permute.xlu0 %849 }
 0x563   : >> { %1791 = vrcp.f32 %v843_v3  ;;  %862 = vmatpush.bf16.msrb.mxu3 %v850_v7 }
 0x564   : >> { %1793 = vrcp.f32 %v929_v0 }
 0x565   : >> { %1795 = vrcp.f32 %v932_v1 }
 0x569   : >> { %v1792_v11 = vpop.eup %1791 }
 0x56a   : >> { %v847_v12 = vmul.f32 %v1792_v11, %v1784_v57  ;;  %v1794_v6 = vpop.eup %1793 }
 0x56b   : >> { %v1796_v14 = vpop.eup %1795  ;;  %v935_v16 = vmul.f32 %v1794_v6, %v1780_v39 }
 0x56c   : >> { %v848_v13 = vpack.c.bf16 %v847_v12, %v846_v15  ;;  %v936_v19 = vmul.f32 %v1796_v14, %v1778_v23 }
 0x56e   : >> { %1617 = vmatmul.msk.bf16.vlgmr.msrb.gmra.mxu3 %vm653_vm4, %v848_v13  ;;  %v937_v22 = vpack.c.bf16 %v936_v19, %v935_v16 }
 0x579   : >> { %v775_v17 = vpop.f32.mrf.mxu3 }
 0x57a   : >> { %v780_v20 = vpack.c.bf16 %v775_v17, %v775_v17  ;;  %v939_v21 = vpop.permute.xlu1 %938 }
 0x57b   : >> { %951 = vmatpush.bf16.msrb.mxu2 %v939_v21  ;;  %v1694_v21 = vld [vmem:[%s1963_s23 + $0x8] sm:$0xff] (%p612_p6) }
 0x57c   : >> { %784 = vrot.lane.b32.xlu2 %v780_v20, %s1875_s22  ;;  %1160 = vmatpush.bf16.msra.mxu1 (%p612_p6), %v1694_v21 }
 0x57e   : >> { %1623 = vmatmul.msk.bf16.vlgmr.msrb.gmra.mxu2 %vm653_vm4, %v937_v22 }
 0x581   : >> { %v777_v25 = vpop.f32.mrf.mxu3 }
 0x582   : >> { %v781_v26 = vpack.c.bf16 %v777_v25, %v777_v25 }
 0x584   : >> { %786 = vrot.lane.b32.xlu2 %v781_v26, %s1875_s22  ;;  %v1693_v26 = vld [vmem:[%s1963_s23] sm:$0xff] (%p612_p6) }
 0x585   : > { %1161 = vmatpush.bf16.msra.mxu1 (%p612_p6), %v1693_v26  ;;  %v1135_v26 = vperm.slane (%p612_p6), %v2042_v47, 0  ;;  %v1695_v47 = vld [vmem:[%s1968_s10] sm:$0xff] (%p612_p6) }
 0x5d6   : >> { %v785_v27 = vpop.permute.xlu2 %784 }
 0x5d7   : >> { %791 = vst.msk [vmem:[%s2131_s19] sm:$0xf] %vm790_vm6, %v785_v27 }
 0x5de   : >> { %v787_v28 = vpop.permute.xlu2 %786 }
 0x5df   : >> { %792 = vst.msk [vmem:[%s2131_s19 + $0x4] sm:$0xf] %vm790_vm6, %v787_v28 }
 0x5f1   : >> { %v864_v29 = vpop.f32.mrf.mxu3 }
 0x5f2   : >> { %v869_v30 = vpack.c.bf16 %v864_v29, %v864_v29 }
 0x5f4   : >> { %873 = vrot.lane.b32.xlu0 %v869_v30, %s1876_s24 }
 0x5f9   : >> { %v866_v31 = vpop.f32.mrf.mxu3 }
 0x5fa   : >> { %v870_v32 = vpack.c.bf16 %v866_v31, %v866_v31 }
 0x5fc   : >> { %875 = vrot.lane.b32.xlu2 %v870_v32, %s1876_s24 }
 0x601   : >> { %v953_v35 = vpop.f32.mrf.mxu2 }
 0x602   : >> { %v958_v36 = vpack.c.bf16 %v953_v35, %v953_v35 }
 0x604   : >> { %962 = vrot.lane.b32.xlu1 %v958_v36, %s1877_s25 }
 0x609   : >> { %v955_v37 = vpop.f32.mrf.mxu2 }
 0x60a   : >> { %v959_v23 = vpack.c.bf16 %v955_v37, %v955_v37 }
 0x60c   : >> { %964 = vrot.lane.b32.xlu0 %v959_v23, %s1877_s25 }
 0x656   : >> { %v876_v38 = vpop.permute.xlu2 %875 }
 0x657   : >> { %881 = vst.msk [vmem:[%s2131_s19 + $0x4] sm:$0xf] %vm879_vm7, %v876_v38 }
 0x666   : >> { %v874_v39 = vpop.permute.xlu0 %873 }
 0x667   : >> { %880 = vst.msk [vmem:[%s2131_s19] sm:$0xf] %vm879_vm7, %v874_v39 }
 0x676   : >> { %v963_v40 = vpop.permute.xlu1 %962 }
 0x677   : >> { %969 = vst.msk [vmem:[%s2131_s19] sm:$0xf] %vm968_vm8, %v963_v40 }
 0x67b   : > { %614 = sbr.rel (!%p612_p6) target bundleno = 451 (0x1c3), region = 114 }
 0x67e   : >> { %v965_v24 = vpop.permute.xlu0 %964 }
 0x67f   : >> { %970 = vst.msk [vmem:[%s2131_s19 + $0x4] sm:$0xf] %vm968_vm8, %v965_v24 }
 0x686   : > { %v1689_v46 = vld [vmem:[#allocation4] sm:$0xff]  ;;  %v1690_v49 = vld [vmem:[#allocation4 + $0x8] sm:$0xff] }
 0x687   : > { %1640 = vmatmul.msk.bf16.vlgmr.msra.gmra.mxu0 %vm444_vm1, %v1689_v46 }
 0x697   : > { %1641 = vmatmul.msk.bf16.gmra.mxu0 %vm444_vm1, %v1690_v49 }
 0x704   : > { %v1017_v52 = vpop.f32.mrf.mxu0 }
 0x705   : > { %v1018_v53 = vadd.f32 %v1017_v52, %v979_v33 }
 0x707   : > { %v2169_v54 = vadd.f32 %v1018_v53, %v1985_v5 }
 0x709   : > { %v1031_v50 = vsel %vm444_vm1, %v2169_v54, 0.0 }
 0x70a   : > { %1032 = vadd.xlane.f32.xlu0 %v1031_v50 }
 0x70c   : > { %v1019_v51 = vpop.f32.mrf.mxu0 }
 0x70d   : > { %v1020_v34 = vadd.f32 %v1019_v51, %v979_v33 }
 0x70f   : > { %v2174_v55 = vadd.f32 %v1020_v34, %v1993_v9 }
 0x711   : > { %v1034_v56 = vsel %vm444_vm1, %v2174_v55, 0.0 }
 0x712   : > { %1035 = vadd.xlane.f32.xlu0 %v1034_v56  ;;  %v1119_v56 = vperm.slane %v2034_v43, 0 }
 0x714   : > { %v1022_v57 = vpop.f32.mrf.mxu0 }
 0x715   : > { %v1023_v42 = vadd.f32 %v1022_v57, %v979_v33 }
 0x717   : > { %v2179_v58 = vadd.f32 %v1023_v42, %v1983_v4 }
 0x719   : > { %v1037_v5 = vsel %vm444_vm1, %v2179_v58, 0.0 }
 0x71a   : > { %1038 = vadd.xlane.f32.xlu1 %v1037_v5 }
 0x71c   : > { %v1024_v59 = vpop.f32.mrf.mxu0 }
 0x71d   : > { %v1025_v60 = vadd.f32 %v1024_v59, %v979_v33 }
 0x71f   : > { %v2184_v61 = vadd.f32 %v1025_v60, %v1991_v8 }
 0x721   : > { %v1040_v9 = vsel %vm444_vm1, %v2184_v61, 0.0 }
 0x722   : > { %1041 = vadd.xlane.f32.xlu1 %v1040_v9 }
 0x77d   : > { %v1033_v62 = vpop.xlane.xlu0 %1032 }
 0x77e   : > { %v1043_v63 = vmul.f32 %v1033_v62, %v1999_v18  ;;  %v1124_v62 = vperm.slane %v2037_v44, 0 }
 0x780   : > { %v1047_v0 = vsub.f32 %v2169_v54, %v1043_v63 }
 0x782   : > { %v1051_v4 = vmul.f32 %v1047_v0, %v1047_v0 }
 0x784   : > { %v1055_v1 = vsel %vm444_vm1, %v1051_v4, 0.0 }
 0x785   : > { %1056 = vadd.xlane.f32.xlu2 %v1055_v1  ;;  %v1036_v2 = vpop.xlane.xlu0 %1035 }
 0x786   : > { %v1044_v3 = vmul.f32 %v1036_v2, %v1999_v18 }
 0x788   : > { %v1048_v7 = vsub.f32 %v2174_v55, %v1044_v3 }
 0x78a   : > { %v1052_v8 = vmul.f32 %v1048_v7, %v1048_v7 }
 0x78c   : > { %v1058_v10 = vsel %vm444_vm1, %v1052_v8, 0.0 }
 0x78d   : > { %v1039_v11 = vpop.xlane.xlu1 %1038  ;;  %1059 = vadd.xlane.f32.xlu2 %v1058_v10 }
 0x78e   : > { %v1045_v15 = vmul.f32 %v1039_v11, %v1999_v18 }
 0x790   : > { %v2196_v12 = vsub.f32 %v2179_v58, %v1045_v15 }
 0x792   : > { %v1053_v13 = vmul.f32 %v2196_v12, %v2196_v12 }
 0x794   : > { %v1061_v6 = vsel %vm444_vm1, %v1053_v13, 0.0 }
 0x795   : > { %v1042_v14 = vpop.xlane.xlu1 %1041  ;;  %1062 = vadd.xlane.f32.xlu0 %v1061_v6 }
 0x796   : > { %v1046_v16 = vmul.f32 %v1042_v14, %v1999_v18 }
 0x798   : > { %v2203_v17 = vsub.f32 %v2184_v61, %v1046_v16 }
 0x79a   : > { %v1054_v19 = vmul.f32 %v2203_v17, %v2203_v17 }
 0x79c   : > { %v1064_v20 = vsel %vm444_vm1, %v1054_v19, 0.0 }
 0x79d   : > { %1065 = vadd.xlane.f32.xlu1 %v1064_v20 }
 0x7f8   : > { %v1057_v22 = vpop.xlane.xlu2 %1056 }
 0x7f9   : > { %v1067_v25 = vmul.f32 %v1057_v22, %v1999_v18 }
 0x7fb   : > { %v1071_v27 = vadd.f32 1e-05, %v1067_v25 }
 0x7fd   : > { %1797 = vrsqrt.f32 %v1071_v27  ;;  %vm1081_vm10 = vweird.f32 %v1071_v27 }
 0x800   : > { %v1060_v28 = vpop.xlane.xlu2 %1059 }
 0x801   : > { %v1068_v29 = vmul.f32 %v1060_v28, %v1999_v18 }
 0x803   : > { %v1798_v30 = vpop.eup %1797  ;;  %v1072_v31 = vadd.f32 1e-05, %v1068_v29  ;;  %v1697_v29 = vld [vmem:[%s1968_s10 + $0x10] sm:$0xff] }
 0x804   : > { %v1076_v32 = vmul.f32 %v1798_v30, %v1071_v27  ;;  %vm1082_vm9 = vweird.f32 %v1798_v30  ;;  %v1698_v27 = vld [vmem:[%s1968_s10 + $0x18] sm:$0xff] }
 0x805   : > { %1799 = vrsqrt.f32 %v1072_v31  ;;  %vm1083_vm11 = vmor %vm1081_vm10, %vm1082_vm9  ;;  %vm1091_vm13 = vweird.f32 %v1072_v31  ;;  %1303 = vmatpush.bf16.msra.mxu2 %v1698_v27  ;;  %1701 = vmatpush.bf16.msra.mxu3 %v1698_v27 }
 0x806   : > { %v1077_v35 = vmul.f32 %v1798_v30, %v1076_v32 }
 0x808   : > { %v1078_v36 = vmul.f32 0.5, %v1077_v35  ;;  %v1063_v37 = vpop.xlane.xlu0 %1062 }
 0x809   : > { %v1069_v23 = vmul.f32 %v1063_v37, %v1999_v18  ;;  %1304 = vmatpush.bf16.msra.mxu2 %v1697_v29  ;;  %1702 = vmatpush.bf16.msra.mxu3 %v1697_v29 }
 0x80a   : > { %v1079_v38 = vsub.f32 1.5, %v1078_v36 }
 0x80b   : > { %v1800_v39 = vpop.eup %1799  ;;  %v1073_v40 = vadd.f32 1e-05, %v1069_v23 }
 0x80c   : > { %v1080_v24 = vmul.f32 %v1798_v30, %v1079_v38  ;;  %v1086_v41 = vmul.f32 %v1800_v39, %v1072_v31  ;;  %vm1092_vm12 = vweird.f32 %v1800_v39  ;;  %v1696_v31 = vld [vmem:[%s1968_s10 + $0x8] sm:$0xff] }
 0x80d   : > { %1801 = vrsqrt.f32 %v1073_v40  ;;  %vm1093_vm14 = vmor %vm1091_vm13, %vm1092_vm12  ;;  %vm1101_vm0 = vweird.f32 %v1073_v40  ;;  %1305 = vmatpush.bf16.msra.mxu2 %v1696_v31  ;;  %1703 = vmatpush.bf16.msra.mxu3 %v1696_v31 }
 0x80e   : > { %v1087_v45 = vmul.f32 %v1800_v39, %v1086_v41  ;;  %v1084_v33 = vsel %vm1083_vm11, %v1798_v30, %v1080_v24 }
 0x80f   : > { %v1115_v34 = vmul.f32 %v1084_v33, %v1047_v0 }
 0x810   : > { %v1088_v46 = vmul.f32 0.5, %v1087_v45  ;;  %v1066_v49 = vpop.xlane.xlu1 %1065 }
 0x811   : > { %v1070_v52 = vmul.f32 %v1066_v49, %v1999_v18  ;;  %v1120_v9 = vmul.f32 %v1119_v56, %v1115_v34  ;;  %1306 = vmatpush.bf16.msra.mxu2 %v1695_v47  ;;  %1704 = vmatpush.bf16.msra.mxu3 %v1695_v47 }
 0x812   : > { %v1089_v53 = vsub.f32 1.5, %v1088_v46 }
 0x813   : > { %v1802_v50 = vpop.eup %1801  ;;  %v1074_v51 = vadd.f32 1e-05, %v1070_v52  ;;  %v1125_v3 = vadd.f32 %v1124_v62, %v1120_v9 }
 0x814   : > { %v1090_v57 = vmul.f32 %v1800_v39, %v1089_v53  ;;  %v1096_v42 = vmul.f32 %v1802_v50, %v1073_v40  ;;  %vm1102_vm15 = vweird.f32 %v1802_v50 }
 0x815   : > { %1803 = vrsqrt.f32 %v1074_v51  ;;  %vm1103_vm2 = vmor %vm1101_vm0, %vm1102_vm15  ;;  %vm1111_vm4 = vweird.f32 %v1074_v51 }
 0x816   : > { %v1094_v5 = vsel %vm1093_vm14, %v1800_v39, %v1090_v57  ;;  %v1097_v59 = vmul.f32 %v1802_v50, %v1096_v42  ;;  %vm1292_vm14 = vcmask 523264  }
 0x817   : > { %v1116_v60 = vmul.f32 %v1094_v5, %v1048_v7 }
 0x818   : > { %v1098_v63 = vmul.f32 0.5, %v1097_v59 }
 0x819   : > { %v1121_v4 = vmul.f32 %v1119_v56, %v1116_v60 }
 0x81a   : > { %v1099_v1 = vsub.f32 1.5, %v1098_v63 }
 0x81b   : > { %v1804_v2 = vpop.eup %1803  ;;  %v1126_v8 = vadd.f32 %v1124_v62, %v1121_v4 }
 0x81c   : > { %v1100_v0 = vmul.f32 %v1802_v50, %v1099_v1  ;;  %v1106_v43 = vmul.f32 %v1804_v2, %v1074_v51  ;;  %vm1112_vm3 = vweird.f32 %v1804_v2 }
 0x81d   : > { %v1129_v10 = vpack.c.bf16 %v1126_v8, %v1125_v3  ;;  %vm1113_vm5 = vmor %vm1111_vm4, %vm1112_vm3 }
 0x81e   : > { %v1107_v11 = vmul.f32 %v1804_v2, %v1106_v43  ;;  %v1104_v15 = vsel %vm1103_vm2, %v1802_v50, %v1100_v0 }
 0x81f   : > { %1650 = vmatmul.msk.bf16.vlgmr.msra.gmra.mxu1 %vm444_vm1, %v1129_v10  ;;  %v1117_v44 = vmul.f32 %v1104_v15, %v2196_v12 }
 0x820   : > { %v1108_v7 = vmul.f32 0.5, %v1107_v11 }
 0x821   : > { %v1122_v19 = vmul.f32 %v1119_v56, %v1117_v44 }
 0x822   : > { %v1109_v13 = vsub.f32 1.5, %v1108_v7 }
 0x823   : > { %v1127_v21 = vadd.f32 %v1124_v62, %v1122_v19 }
 0x824   : > { %v1110_v6 = vmul.f32 %v1804_v2, %v1109_v13 }
 0x826   : > { %v1114_v14 = vsel %vm1113_vm5, %v1804_v2, %v1110_v6 }
 0x827   : > { %v1118_v16 = vmul.f32 %v1114_v14, %v2203_v17 }
 0x829   : > { %v1123_v20 = vmul.f32 %v1119_v56, %v1118_v16 }
 0x82b   : > { %v1128_v22 = vadd.f32 %v1124_v62, %v1123_v20 }
 0x82d   : > { %v1130_v25 = vpack.c.bf16 %v1128_v22, %v1127_v21 }
 0x82f   : > { %1651 = vmatmul.msk.bf16.gmra.mxu1 %vm444_vm1, %v1130_v25 }
 0x89c   : > { %v1163_v12 = vpop.f32.mrf.mxu1 }
 0x89d   : > { %v2222_v28 = vadd.f32 %v1163_v12, %v1135_v26 }
 0x89f   : > { %v1652_v17 = vmul.f32 -1.702, %v2222_v28 }
 0x8a1   : > { %v1181_v30 = vmul.f32 1.442695, %v1652_v17 }
 0x8a3   : > { %1805 = vpow2.f32 %v1181_v30 }
 0x8a4   : > { %v1165_v32 = vpop.f32.mrf.mxu1 }
 0x8a5   : > { %v1166_v35 = vadd.f32 %v1165_v32, %v1135_v26 }
 0x8a7   : > { %v1653_v36 = vmul.f32 -1.702, %v1166_v35 }
 0x8a9   : > { %v1806_v37 = vpop.eup %1805  ;;  %v1183_v23 = vmul.f32 1.442695, %v1653_v36 }
 0x8aa   : > { %v1189_v38 = vadd.f32 1.0, %v1806_v37 }
 0x8ab   : > { %1807 = vpow2.f32 %v1183_v23 }
 0x8ac   : > { %1809 = vrcp.f32 %v1189_v38  ;;  %v1168_v39 = vpop.f32.mrf.mxu1  ;;  %v1204_v9 = vand.u32 2147483648, %v1189_v38  ;;  %vm1198_vm7 = vweird.f32 %v1189_v38  ;;  %v1202_v62 = vand.u32 2147483647, %v1189_v38 }
 0x8ad   : > { %v2228_v40 = vadd.f32 %v1168_v39, %v1135_v26 }
 0x8ae   : > { %v1205_v8 = vor.u32 1.1754944e-38, %v1204_v9  ;;  %vm1203_vm10 = vcmp.eq.f32.partialorder %v1202_v62, 8.507059e+37 }
 0x8af   : > { %v1654_v24 = vmul.f32 -1.702, %v2228_v40 }
 0x8b1   : > { %v1808_v41 = vpop.eup %1807  ;;  %v1185_v45 = vmul.f32 1.442695, %v1654_v24 }
 0x8b2   : > { %v1810_v46 = vpop.eup %1809  ;;  %v1190_v49 = vadd.f32 1.0, %v1808_v41  ;;  %v1267_v41 = vperm.slane %v2045_v48, 0 }
 0x8b3   : > { %v1194_v33 = vmul.f32 %v1810_v46, %v1189_v38  ;;  %1811 = vpow2.f32 %v1185_v45  ;;  %vm1199_vm6 = vweird.f32 %v1810_v46 }
 0x8b4   : > { %1813 = vrcp.f32 %v1190_v49  ;;  %v1170_v52 = vpop.f32.mrf.mxu1  ;;  %vm1200_vm8 = vmor %vm1198_vm7, %vm1199_vm6  ;;  %v1219_v4 = vand.u32 2147483648, %v1190_v49  ;;  %v1217_v3 = vand.u32 2147483647, %v1190_v49  ;;  %vm1213_vm11 = vweird.f32 %v1190_v49 }
 0x8b5   : > { %v1195_v53 = vsub.f32 1.0, %v1194_v33  ;;  %v2231_v50 = vadd.f32 %v1170_v52, %v1135_v26 }
 0x8b6   : > { %v1220_v15 = vor.u32 1.1754944e-38, %v1219_v4  ;;  %vm1218_vm13 = vcmp.eq.f32.partialorder %v1217_v3, 8.507059e+37 }
 0x8b7   : > { %v1196_v51 = vmul.f32 %v1810_v46, %v1195_v53  ;;  %v1655_v34 = vmul.f32 -1.702, %v2231_v50 }
 0x8b9   : > { %v1812_v56 = vpop.eup %1811  ;;  %v1187_v57 = vmul.f32 1.442695, %v1655_v34  ;;  %v1197_v59 = vadd.f32 %v1810_v46, %v1196_v51 }
 0x8ba   : > { %v1814_v42 = vpop.eup %1813  ;;  %v1191_v5 = vadd.f32 1.0, %v1812_v56 }
 0x8bb   : > { %v1209_v60 = vmul.f32 %v1814_v42, %v1190_v49  ;;  %1815 = vpow2.f32 %v1187_v57  ;;  %v1201_v1 = vsel %vm1200_vm8, %v1810_v46, %v1197_v59  ;;  %vm1214_vm9 = vweird.f32 %v1814_v42 }
 0x8bc   : > { %1817 = vrcp.f32 %v1191_v5  ;;  %v1206_v11 = vsel %vm1203_vm10, %v1205_v8, %v1201_v1  ;;  %vm1215_vm12 = vmor %vm1213_vm11, %vm1214_vm9  ;;  %v1234_v27 = vand.u32 2147483648, %v1191_v5  ;;  %vm1228_vm0 = vweird.f32 %v1191_v5 }
 0x8bd   : > { %v1210_v63 = vsub.f32 1.0, %v1209_v60  ;;  %v1253_v14 = vmul.f32 %v1206_v11, %v2222_v28  ;;  %v1232_v12 = vand.u32 2147483647, %v1191_v5 }
 0x8be   : > { %v1235_v32 = vor.u32 1.1754944e-38, %v1234_v27 }
 0x8bf   : > { %v1211_v2 = vmul.f32 %v1814_v42, %v1210_v63  ;;  %vm1233_vm4 = vcmp.eq.f32.partialorder %v1232_v12, 8.507059e+37 }
 0x8c1   : > { %v1816_v0 = vpop.eup %1815  ;;  %v1212_v43 = vadd.f32 %v1814_v42, %v1211_v2 }
 0x8c2   : > { %v1818_v10 = vpop.eup %1817  ;;  %v1192_v7 = vadd.f32 1.0, %v1816_v0 }
 0x8c3   : > { %v1216_v13 = vsel %vm1215_vm12, %v1814_v42, %v1212_v43  ;;  %v1224_v44 = vmul.f32 %v1818_v10, %v1191_v5  ;;  %vm1229_vm15 = vweird.f32 %v1818_v10 }
 0x8c4   : > { %v1221_v6 = vsel %vm1218_vm13, %v1220_v15, %v1216_v13  ;;  %1819 = vrcp.f32 %v1192_v7  ;;  %vm1230_vm2 = vmor %vm1228_vm0, %vm1229_vm15  ;;  %v1249_v17 = vand.u32 2147483648, %v1192_v7  ;;  %v1247_v28 = vand.u32 2147483647, %v1192_v7 }
 0x8c5   : > { %v1254_v16 = vmul.f32 %v1221_v6, %v1166_v35  ;;  %v1225_v19 = vsub.f32 1.0, %v1224_v44  ;;  %vm1243_vm5 = vweird.f32 %v1192_v7 }
 0x8c6   : > { %v1250_v36 = vor.u32 1.1754944e-38, %v1249_v17  ;;  %vm1248_vm7 = vcmp.eq.f32.partialorder %v1247_v28, 8.507059e+37 }
 0x8c7   : > { %v1226_v20 = vmul.f32 %v1818_v10, %v1225_v19  ;;  %v1257_v21 = vpack.c.bf16 %v1254_v16, %v1253_v14 }
 0x8c9   : > { %1672 = vmatmul.msk.bf16.vlgmr.msra.gmra.mxu2 %vm1292_vm14, %v1257_v21  ;;  %v1227_v25 = vadd.f32 %v1818_v10, %v1226_v20 }
 0x8ca   : > { %v1820_v22 = vpop.eup %1819 }
 0x8cb   : > { %v1239_v26 = vmul.f32 %v1820_v22, %v1192_v7  ;;  %v1231_v30 = vsel %vm1230_vm2, %v1818_v10, %v1227_v25  ;;  %vm1244_vm3 = vweird.f32 %v1820_v22 }
 0x8cc   : > { %v1236_v47 = vsel %vm1233_vm4, %v1235_v32, %v1231_v30  ;;  %vm1245_vm6 = vmor %vm1243_vm5, %vm1244_vm3 }
 0x8cd   : > { %v1240_v29 = vsub.f32 1.0, %v1239_v26  ;;  %v1255_v38 = vmul.f32 %v1236_v47, %v2228_v40 }
 0x8cf   : > { %v1241_v31 = vmul.f32 %v1820_v22, %v1240_v29 }
 0x8d1   : > { %v1242_v35 = vadd.f32 %v1820_v22, %v1241_v31 }
 0x8d3   : > { %v1246_v37 = vsel %vm1245_vm6, %v1820_v22, %v1242_v35 }
 0x8d4   : > { %v1251_v23 = vsel %vm1248_vm7, %v1250_v36, %v1246_v37 }
 0x8d5   : > { %v1256_v39 = vmul.f32 %v1251_v23, %v2231_v50 }
 0x8d7   : > { %v1258_v24 = vpack.c.bf16 %v1256_v39, %v1255_v38 }
 0x8d9   : > { %1673 = vmatmul.msk.bf16.vlgmr.msra.gmra.mxu3 %vm1292_vm14, %v1258_v24 }
 0x94c   : > { %v1308_v45 = vpop.f32.mrf.mxu2 }
 0x94d   : > { %v1309_v46 = vadd.f32 %v1308_v45, %v1267_v41 }
 0x94f   : > { %v1318_v49 = vadd.f32 %v1309_v46, %v2169_v54 }
 0x951   : > { %1322 = vst.msk [vmem:[#allocation2] sm:$0xff] %vm444_vm1, %v1318_v49 }
 0x954   : > { %v1310_v33 = vpop.f32.mrf.mxu2 }
 0x955   : > { %v1311_v52 = vadd.f32 %v1310_v33, %v1267_v41 }
 0x957   : > { %v1319_v53 = vadd.f32 %v1311_v52, %v2174_v55 }
 0x959   : > { %1323 = vst.msk [vmem:[#allocation2 + $0x8] sm:$0xff] %vm444_vm1, %v1319_v53 }
 0x95c   : > { %v1313_v40 = vpop.f32.mrf.mxu3 }
 0x95d   : > { %v1314_v51 = vadd.f32 %v1313_v40, %v1267_v41 }
 0x95f   : > { %v1320_v50 = vadd.f32 %v1314_v51, %v2179_v58 }
 0x961   : > { %1324 = vst.msk [vmem:[#allocation2 + $0x10] sm:$0xff] %vm444_vm1, %v1320_v50 }
 0x964   : > { %v1315_v34 = vpop.f32.mrf.mxu3 }
 0x965   : > { %v1316_v48 = vadd.f32 %v1315_v34, %v1267_v41  ;;  %1329 = sbr.rel (%p1674_p7) target bundleno = 2688 (0xa80), region = 67 }
 0x967   : > { %v1321_v56 = vadd.f32 %v1316_v48, %v2184_v61 }
 0x969   : > { %1325 = vst.msk [vmem:[#allocation2 + $0x18] sm:$0xff] %vm444_vm1, %v1321_v56 }
 0x96a   : > { %v1338_v54 = vsel %vm444_vm1, %v1320_v50, 0.0  ;;  %v1332_v55 = vsel %vm444_vm1, %v1318_v49, 0.0  ;;  %v1341_v57 = vsel %vm444_vm1, %v1321_v56, 0.0  ;;  %v1335_v58 = vsel %vm444_vm1, %v1319_v53, 0.0  ;;  %v1821_v24 = vld [vmem:[%s2317_s6] ss:$0 sm:$0xff] }
 0x96b   : > { %1339 = vadd.xlane.f32.xlu1 %v1338_v54  ;;  %1333 = vadd.xlane.f32.xlu0 %v1332_v55  ;;  %v1822_v52 = vld [vmem:[%s2318_s7] ss:$0 sm:$0xff] }
 0x973   : > { %1342 = vadd.xlane.f32.xlu1 %v1341_v57  ;;  %1336 = vadd.xlane.f32.xlu0 %v1335_v58 }
 0x9de   : > { %v1340_v42 = vpop.xlane.xlu1 %1339  ;;  %v1334_v5 = vpop.xlane.xlu0 %1333 }
 0x9df   : > { %v1346_v61 = vmul.f32 %v1340_v42, %v1999_v18  ;;  %v1344_v59 = vmul.f32 %v1334_v5, %v1999_v18 }
 0x9e1   : > { %v2255_v60 = vsub.f32 %v1320_v50, %v1346_v61  ;;  %v1348_v9 = vsub.f32 %v1318_v49, %v1344_v59 }
 0x9e3   : > { %v1354_v62 = vmul.f32 %v2255_v60, %v2255_v60  ;;  %v1352_v63 = vmul.f32 %v1348_v9, %v1348_v9 }
 0x9e5   : > { %v1362_v4 = vsel %vm444_vm1, %v1354_v62, 0.0  ;;  %v1356_v1 = vsel %vm444_vm1, %v1352_v63, 0.0 }
 0x9e6   : > { %v1343_v2 = vpop.xlane.xlu1 %1342  ;;  %1363 = vadd.xlane.f32.xlu0 %v1362_v4  ;;  %1357 = vadd.xlane.f32.xlu2 %v1356_v1  ;;  %v1337_v3 = vpop.xlane.xlu0 %1336 }
 0x9e7   : > { %v1347_v8 = vmul.f32 %v1343_v2, %v1999_v18  ;;  %v1345_v0 = vmul.f32 %v1337_v3, %v1999_v18 }
 0x9e9   : > { %v2263_v43 = vsub.f32 %v1321_v56, %v1347_v8  ;;  %v2265_v10 = vsub.f32 %v1319_v53, %v1345_v0 }
 0x9eb   : > { %v1355_v11 = vmul.f32 %v2263_v43, %v2263_v43  ;;  %v1353_v15 = vmul.f32 %v2265_v10, %v2265_v10 }
 0x9ed   : > { %v1365_v7 = vsel %vm444_vm1, %v1355_v11, 0.0  ;;  %v1359_v13 = vsel %vm444_vm1, %v1353_v15, 0.0 }
 0x9ee   : > { %1366 = vadd.xlane.f32.xlu1 %v1365_v7  ;;  %1360 = vadd.xlane.f32.xlu2 %v1359_v13 }
 0xa59   : > { %v1358_v44 = vpop.xlane.xlu2 %1357  ;;  %v1364_v6 = vpop.xlane.xlu0 %1363 }
 0xa5a   : > { %v1368_v14 = vmul.f32 %v1358_v44, %v1999_v18  ;;  %v1370_v16 = vmul.f32 %v1364_v6, %v1999_v18 }
 0xa5c   : > { %v1372_v19 = vadd.f32 1e-05, %v1368_v14  ;;  %v1374_v20 = vadd.f32 1e-05, %v1370_v16 }
 0xa5e   : > { %1823 = vrsqrt.f32 %v1372_v19  ;;  %vm1382_vm10 = vweird.f32 %v1372_v19  ;;  %vm1402_vm12 = vweird.f32 %v1374_v20 }
 0xa5f   : > { %1825 = vrsqrt.f32 %v1374_v20 }
 0xa61   : > { %v1367_v21 = vpop.xlane.xlu1 %1366  ;;  %v1361_v22 = vpop.xlane.xlu2 %1360 }
 0xa62   : > { %v1371_v25 = vmul.f32 %v1367_v21, %v1999_v18  ;;  %v1369_v26 = vmul.f32 %v1361_v22, %v1999_v18 }
 0xa64   : > { %v1824_v27 = vpop.eup %1823  ;;  %v1375_v12 = vadd.f32 1e-05, %v1371_v25  ;;  %v1373_v29 = vadd.f32 1e-05, %v1369_v26 }
 0xa65   : > { %v1826_v17 = vpop.eup %1825  ;;  %v1377_v30 = vmul.f32 %v1824_v27, %v1372_v19  ;;  %vm1383_vm8 = vweird.f32 %v1824_v27 }
 0xa66   : > { %v1397_v31 = vmul.f32 %v1826_v17, %v1374_v20  ;;  %1827 = vrsqrt.f32 %v1375_v12  ;;  %vm1403_vm9 = vweird.f32 %v1826_v17  ;;  %vm1384_vm11 = vmor %vm1382_vm10, %vm1383_vm8  ;;  %vm1412_vm0 = vweird.f32 %v1375_v12 }
 0xa67   : > { %v1378_v28 = vmul.f32 %v1824_v27, %v1377_v30  ;;  %1829 = vrsqrt.f32 %v1373_v29  ;;  %vm1404_vm13 = vmor %vm1402_vm12, %vm1403_vm9  ;;  %vm1392_vm3 = vweird.f32 %v1373_v29 }
 0xa68   : > { %v1398_v32 = vmul.f32 %v1826_v17, %v1397_v31 }
 0xa69   : > { %v1379_v35 = vmul.f32 0.5, %v1378_v28 }
 0xa6a   : > { %v1399_v47 = vmul.f32 0.5, %v1398_v32 }
 0xa6b   : > { %v1380_v36 = vsub.f32 1.5, %v1379_v35 }
 0xa6c   : > { %v1828_v37 = vpop.eup %1827  ;;  %v1400_v23 = vsub.f32 1.5, %v1399_v47 }
 0xa6d   : > { %v1830_v38 = vpop.eup %1829  ;;  %v1381_v39 = vmul.f32 %v1824_v27, %v1380_v36  ;;  %v1407_v18 = vmul.f32 %v1828_v37, %v1375_v12  ;;  %vm1413_vm14 = vweird.f32 %v1828_v37 }
 0xa6e   : > { %v1401_v41 = vmul.f32 %v1826_v17, %v1400_v23  ;;  %v1387_v45 = vmul.f32 %v1830_v38, %v1373_v29  ;;  %vm1393_vm15 = vweird.f32 %v1830_v38  ;;  %vm1414_vm2 = vmor %vm1412_vm0, %vm1413_vm14 }
 0xa6f   : > { %v1385_v46 = vsel %vm1384_vm11, %v1824_v27, %v1381_v39  ;;  %v1408_v49 = vmul.f32 %v1828_v37, %v1407_v18  ;;  %vm1394_vm4 = vmor %vm1392_vm3, %vm1393_vm15 }
 0xa70   : > { %v1416_v33 = vmul.f32 %v1385_v46, %v1348_v9  ;;  %v1405_v53 = vsel %vm1404_vm13, %v1826_v17, %v1401_v41  ;;  %v1388_v40 = vmul.f32 %v1830_v38, %v1387_v45 }
 0xa71   : > { %v1418_v51 = vmul.f32 %v1405_v53, %v2255_v60  ;;  %v1409_v50 = vmul.f32 0.5, %v1408_v49 }
 0xa72   : > { %v1423_v34 = vmul.f32 %v1821_v24, %v1416_v33  ;;  %v1389_v48 = vmul.f32 0.5, %v1388_v40 }
 0xa73   : > { %v1425_v56 = vmul.f32 %v1821_v24, %v1418_v51  ;;  %v1410_v54 = vsub.f32 1.5, %v1409_v50 }
 0xa74   : > { %v1430_v55 = vadd.f32 %v1822_v52, %v1423_v34  ;;  %v1390_v57 = vsub.f32 1.5, %v1389_v48 }
 0xa75   : > { %v1432_v58 = vadd.f32 %v1822_v52, %v1425_v56  ;;  %v1411_v42 = vmul.f32 %v1828_v37, %v1410_v54 }
 0xa76   : > { %1434 = vst.msk [vmem:[%s2319_s8] sm:$0xff] %vm444_vm1, %v1430_v55  ;;  %v1391_v5 = vmul.f32 %v1830_v38, %v1390_v57 }
 0xa77   : > { %1436 = vst.msk [vmem:[%s2319_s8 + $0x10] sm:$0xff] %vm444_vm1, %v1432_v58  ;;  %v1415_v61 = vsel %vm1414_vm2, %v1828_v37, %v1411_v42 }
 0xa78   : > { %v1419_v59 = vmul.f32 %v1415_v61, %v2263_v43  ;;  %v1395_v60 = vsel %vm1394_vm4, %v1830_v38, %v1391_v5 }
 0xa79   : > { %v1417_v9 = vmul.f32 %v1395_v60, %v2265_v10 }
 0xa7a   : > { %v1426_v62 = vmul.f32 %v1821_v24, %v1419_v59 }
 0xa7b   : > { %v1424_v63 = vmul.f32 %v1821_v24, %v1417_v9 }
 0xa7c   : > { %v1433_v4 = vadd.f32 %v1822_v52, %v1426_v62 }
 0xa7d   : > { %v1431_v1 = vadd.f32 %v1822_v52, %v1424_v63 }
 0xa7e   : > { %1437 = vst.msk [vmem:[%s2319_s8 + $0x18] sm:$0xff] %vm444_vm1, %v1433_v4 }
 0xa7f   : > { %1435 = vst.msk [vmem:[%s2319_s8 + $0x8] sm:$0xff] %vm444_vm1, %v1431_v1 }
 0xa80 PF: > { %s18_s29 = sadd.s32 1, %s1857_s29   ;;  %s2320_s27 = smov %s1853_s28 }
 0xa81   : > { %p15_p8 = scmp.ge.s32.totalorder %s18_s29, 4   ;;  %s2321_s28 = smov %s2323_s30 }
 0xa83   :  { %17 = sbr.rel (!%p15_p8) target bundleno = 2 (0x2), region = 125 }

</bundles_post_ra>
